<compile_context>
chip_gen: v7x
topology: tpu7x:2x2x1
jax: 0.10.0
libtpu: 0.0.40
codegen_flags: <defaults>
</compile_context>

<pallas_src>
import functools

import jax
import jax.numpy as jnp
from jax.experimental import pallas as pl
from jax.experimental.pallas import tpu as pltpu


def _rise_kernel(m_ref, u_ref, b_ref, out_ref, *, n_masks, tile_n, steps,
                 ragged):
    """One grid step: a (tile_n, HW) tile of masks -> (K, HW) salience partial.

    m_ref  : (TN, HW)  mask tile                       (compute dtype)
    u_ref  : (HW, K)   x_flat.T @ W / (HW * N * prob)  (compute dtype)
    b_ref  : (1,  K)   bias / (N * prob)               (f32)
    out_ref: (K,  HW)  f32 accumulator, VMEM-resident across the reduction axis
    """
    p = pl.program_id(0)
    s = pl.program_id(1)

    @pl.when(s == 0)
    def _():
        out_ref[...] = jnp.zeros_like(out_ref)

    m = m_ref[...]                                               # (TN, HW)

    if ragged:
        # Zero rows past the true mask count.  `blk` is the *unclamped*
        # logical block index, so fully out-of-range steps (possible when
        # num_partials does not divide the block count) zero the whole tile.
        # Masking m (not logits) keeps the padded contribution exactly 0 and
        # never lets garbage from the padded DMA region reach the MXU.
        blk = p * steps + s
        valid = n_masks - blk * tile_n
        row = jax.lax.broadcasted_iota(jnp.int32, m.shape, 0)
        m = jnp.where(row < valid, m, jnp.zeros_like(m))

    # logits[n, k] = sum_hw m[n, hw] * u[hw, k]  (+ folded, pre-scaled bias)
    logits = jax.lax.dot_general(
        m, u_ref[...], (((1,), (0,)), ((), ())),
        preferred_element_type=jnp.float32) + b_ref[...]         # (TN, K) f32

    # out[k, hw] += sum_n logits[n, k] * m[n, hw]
    # Contracting dim 0 of both operands: m is already in the natural rhs
    # orientation, so only the small (TN, K) logits tile gets transposed.
    out_ref[...] += jax.lax.dot_general(
        logits.astype(m.dtype), m, (((0,), (0,)), ((), ())),
        preferred_element_type=jnp.float32)


def _pick_tile_n(n_masks, num_partials, hw, k, itemsize, budget_bytes):
    """Largest multiple of 256 (<=1024) whose double-buffered footprint fits."""
    fixed = (2 * hw * k * itemsize       # u (grid-invariant, still 2-buffered)
             + 2 * 128 * 4               # bias (padded to one lane-row)
             + k * hw * 4)               # resident f32 accumulator
    avail = max(budget_bytes - fixed, 0)
    t = (avail // (2 * hw * itemsize)) // 256 * 256   # 2-buffered mask stream
    # No point tiling (much) beyond the per-partial mask count.
    n_per_partial = -(-n_masks // num_partials)
    cap = max(128, -(-n_per_partial // 128) * 128)
    return max(128, min(t, 1024, cap))


def rise_forward(x, masks, w_cls, b_cls, prob, *, tile_n=None, num_partials=1,
                 compute_dtype=jnp.bfloat16, vmem_budget_bytes=48 << 20):
    """x: (C, H, W);  masks: (N, 1, H, W).

    Returns the (K, H, W) salience map of RISE.forward with a GAP+Linear(C,K)
    classifier.  `tile_n=None` auto-picks the largest MXU-friendly tile that
    fits the VMEM budget.  Use num_partials=2 on v7x (two TensorCores), 1 on
    v5e/v6e.  For minimal HBM traffic, pass `masks` already in `compute_dtype`
    (e.g. generate them in bf16 upstream) so no wrapper-side cast pass is
    needed.  bf16 streaming gives ~1e-2 relative error vs the f32 reference
    (grows slowly with N); the f32 path matches to ~1e-4.
    """
    C, H, W = x.shape
    N = masks.shape[0]
    K = w_cls.shape[-1]
    HW = H * W
    itemsize = jnp.dtype(compute_dtype).itemsize

    if tile_n is None:
        tile_n = _pick_tile_n(N, num_partials, HW, K, itemsize,
                              vmem_budget_bytes)

    # --- wrapper-side precompute: fold GAP (1/HW) and 1/(N*prob) into u, b ---
    scale = 1.0 / (float(N) * float(prob))
    x_flat = x.reshape(C, HW).astype(jnp.float32)
    u = (x_flat.T @ w_cls.astype(jnp.float32)) * (scale / float(HW))  # (HW, K)
    b = (b_cls.astype(jnp.float32) * scale).reshape(1, K)             # (1, K)
    u = u.astype(compute_dtype)

    # Masks: no padding pass, no cast pass unless the caller's dtype differs.
    m_flat = masks.reshape(N, HW)
    if m_flat.dtype != compute_dtype:
        m_flat = m_flat.astype(compute_dtype)

    total_blocks = pl.cdiv(N, tile_n)
    steps = pl.cdiv(total_blocks, num_partials)
    ragged = (num_partials * steps * tile_n) != N

    # --- VMEM: 2-buffered mask tile + 2-buffered u + bias + f32 accumulator --
    need = (2 * tile_n * HW * itemsize
            + 2 * HW * K * itemsize
            + 2 * 128 * 4
            + K * HW * 4)
    # Clamp <= 56 MiB: leaves headroom on v7x's 64 MiB physical VMEM.
    vmem_limit = int(min(max(need + (4 << 20), 32 << 20), 56 << 20))

    kernel = functools.partial(_rise_kernel, n_masks=N, tile_n=tile_n,
                               steps=steps, ragged=ragged)

    partials = pl.pallas_call(
        kernel,
        out_shape=jax.ShapeDtypeStruct((num_partials, K, HW), jnp.float32),
        grid_spec=pltpu.PrefetchScalarGridSpec(
            num_scalar_prefetch=0,
            grid=(num_partials, steps),
            in_specs=[
                # Mask tiles: partial p owns contiguous blocks.  The clamp
                # keeps the DMA in-bounds for fully out-of-range steps; the
                # kernel zeroes those rows so correctness is exact.
                pl.BlockSpec(
                    (tile_n, HW),
                    lambda p, s, steps=steps, last=total_blocks - 1:
                        (jnp.minimum(p * steps + s, last), 0)),
                pl.BlockSpec((HW, K), lambda p, s: (0, 0)),   # u (resident)
                pl.BlockSpec((1, K), lambda p, s: (0, 0)),    # bias
            ],
            # Output block constant across the reduction axis s -> VMEM-
            # resident accumulator; one (K, HW) partial per parallel slice p.
            out_specs=pl.BlockSpec((None, K, HW), lambda p, s: (p, 0, 0)),
        ),
        compiler_params=pltpu.CompilerParams(
            dimension_semantics=("parallel", "arbitrary"),
            vmem_limit_bytes=vmem_limit),
    )(m_flat, u, b)

    return partials.sum(axis=0).reshape(K, H, W)


def rise_reference(x, masks, w_cls, b_cls, prob):
    """Pure-JAX f32 reference mirroring the PyTorch forward literally."""
    C, H, W = x.shape
    N = masks.shape[0]
    stack = masks * x[None]                                  # (N, C, H, W)
    pooled = stack.mean(axis=(2, 3))                         # (N, C)   GAP model
    logits = pooled @ w_cls + b_cls                          # (N, K)
    sal = logits.T @ masks.reshape(N, H * W)                 # (K, H*W)
    return (sal / (N * prob)).reshape(-1, H, W)


def generate_masks(key, num_mask, mask_size, prob, input_size,
                   dtype=jnp.float32):
    """Deterministic stand-in for RISE.generate_masks (bilinear-upsampled
    random binary grids).  Pass dtype=jnp.bfloat16 in production so the kernel
    streams masks without an extra cast pass."""
    # TODO(synk): the original RISE also applies a per-mask random crop shift
    # (host-side numpy preprocessing); omitted for determinism of this test.
    grid = (jax.random.uniform(key, (num_mask, mask_size, mask_size))
            < prob).astype(jnp.float32)
    up = jax.image.resize(grid, (num_mask, input_size, input_size),
                          method="bilinear")
    return up.reshape(num_mask, 1, input_size, input_size).astype(dtype)


if __name__ == "__main__":
    key = jax.random.PRNGKey(0)
    k_img, k_mask, k_w, k_b = jax.random.split(key, 4)

    # Small shapes consistent with the module's forward: x is (C, H, W).
    C, H, W = 4, 16, 16
    N_MASK = 500         # Num_mask (not a multiple of the tile -> exercises the
                         # in-kernel ragged-tail masking)
    MASK_SIZE = 4
    PROB = 0.5
    K_CLASSES = 8        # class_num of the synthetic GAP+Linear classifier

    x = jax.random.normal(k_img, (C, H, W), dtype=jnp.float32)
    masks_f32 = generate_masks(k_mask, N_MASK, MASK_SIZE, PROB, H,
                               dtype=jnp.float32)
    # Production path: masks emitted in bf16 upstream -> no wrapper cast pass.
    masks_bf16 = masks_f32.astype(jnp.bfloat16)

    w_cls = jax.random.normal(k_w, (C, K_CLASSES), dtype=jnp.float32) * 0.1
    b_cls = jax.random.normal(k_b, (K_CLASSES,), dtype=jnp.float32) * 0.1

    ref = rise_reference(x, masks_f32, w_cls, b_cls, PROB)

    # f32 streaming path: tight check against the pure-JAX reference.
    sal_f32 = rise_forward(x, masks_f32, w_cls, b_cls, PROB,
                           compute_dtype=jnp.float32)
    sal_f32 = jax.block_until_ready(sal_f32)
    assert sal_f32.shape == (K_CLASSES, H, W)
    assert jnp.allclose(sal_f32, ref, atol=1e-4, rtol=1e-4), "f32 mismatch"

    # bf16 streaming path (default / fast): looser tolerance for bf16 inputs.
    sal_bf16 = rise_forward(x, masks_bf16, w_cls, b_cls, PROB,
                            compute_dtype=jnp.bfloat16)
    sal_bf16 = jax.block_until_ready(sal_bf16)
    assert sal_bf16.shape == (K_CLASSES, H, W)
    assert jnp.allclose(sal_bf16, ref, atol=1e-2, rtol=1e-2), "bf16 mismatch"

    print("KERNEL_OK")
</pallas_src>

<mosaic_0001>
module attributes {stable_mosaic.version = 11 : i64} {
  func.func @_rise_kernel(%arg0: i32, %arg1: i32, %arg2: memref<512x256xf32, #tpu.memory_space<vmem>>, %arg3: memref<256x8xf32, #tpu.memory_space<vmem>>, %arg4: memref<1x8xf32, #tpu.memory_space<vmem>>, %arg5: memref<1x8x256xf32, #tpu.memory_space<vmem>>) attributes {dimension_semantics = [#tpu.dimension_semantics<parallel>, #tpu.dimension_semantics<arbitrary>], iteration_bounds = array<i64: 1, 1>, scalar_prefetch = 0 : i64, scratch_operands = 0 : i64, tpu.core_type = #tpu.core_type<tc>, window_params = [{transform_indices = @transform_0, window_bounds = array<i64: 512, 256>}, {pipeline_mode = #tpu.pipeline_mode<synchronous>, transform_indices = @transform_1, window_bounds = array<i64: 256, 8>}, {pipeline_mode = #tpu.pipeline_mode<synchronous>, transform_indices = @transform_2, window_bounds = array<i64: 1, 8>}, {transform_indices = @transform_3, window_bounds = array<i64: 1, 8, 256>}]} {
    %c0_i32 = arith.constant 0 : i32
    %0 = arith.cmpi eq, %arg1, %c0_i32 : i32
    %1 = arith.extui %0 : i1 to i32
    %c0_i32_0 = arith.constant 0 : i32
    %2 = arith.cmpi ne, %1, %c0_i32_0 : i32
    scf.if %2 {
      %cst_14 = arith.constant 0.000000e+00 : f32
      %25 = vector.broadcast %cst_14 : f32 to vector<8x256xf32>
      %c0_15 = arith.constant 0 : index
      %c0_16 = arith.constant 0 : index
      %c0_17 = arith.constant 0 : index
      %26 = vector.load %arg5[%c0_15, %c0_16, %c0_17] : memref<1x8x256xf32, #tpu.memory_space<vmem>>, vector<1x8x256xf32>
      %27 = vector.shape_cast %26 : vector<1x8x256xf32> to vector<8x256xf32>
      %28 = vector.shape_cast %25 : vector<8x256xf32> to vector<1x8x256xf32>
      tpu.vector_store %arg5[%c0_15, %c0_16, %c0_17], %28 {strides = array<i32>} : memref<1x8x256xf32, #tpu.memory_space<vmem>>, vector<1x8x256xf32>,
    } else {
    }
    %c0 = arith.constant 0 : index
    %c0_1 = arith.constant 0 : index
    %3 = vector.load %arg2[%c0, %c0_1] : memref<512x256xf32, #tpu.memory_space<vmem>>, vector<512x256xf32>
    %c1_i32 = arith.constant 1 : i32
    %4 = arith.muli %arg0, %c1_i32 : i32
    %5 = arith.addi %4, %arg1 : i32
    %c512_i32 = arith.constant 512 : i32
    %6 = arith.muli %5, %c512_i32 : i32
    %c500_i32 = arith.constant 500 : i32
    %7 = arith.subi %c500_i32, %6 : i32
    %8 = tpu.iota {dimensions = array<i32: 0>} : vector<512x256xi32>
    %9 = vector.broadcast %7 : i32 to vector<512x256xi32>
    %10 = arith.cmpi slt, %8, %9 : vector<512x256xi32>
    %cst = arith.constant 0.000000e+00 : f32
    %11 = vector.broadcast %cst : f32 to vector<512x256xf32>
    %12 = arith.select %10, %3, %11 : vector<512x256xi1>, vector<512x256xf32>
    %c0_2 = arith.constant 0 : index
    %c0_3 = arith.constant 0 : index
    %13 = vector.load %arg3[%c0_2, %c0_3] : memref<256x8xf32, #tpu.memory_space<vmem>>, vector<256x8xf32>
    %cst_4 = arith.constant dense<0.000000e+00> : vector<512x8xf32>
    %14 = tpu.matmul %12, %13, %cst_4 {dimension_numbers = #tpu.dot_dimension_numbers<[1], [0], [0], [1], [0, 0, 1, 1], [], []>} : vector<512x256xf32>, vector<256x8xf32>, vector<512x8xf32> -> vector<512x8xf32>
    %c0_5 = arith.constant 0 : index
    %c0_6 = arith.constant 0 : index
    %15 = vector.load %arg4[%c0_5, %c0_6] : memref<1x8xf32, #tpu.memory_space<vmem>>, vector<1x8xf32>
    %16 = vector.broadcast %15 : vector<1x8xf32> to vector<512x8xf32>
    %17 = arith.addf %14, %16 : vector<512x8xf32>
    %c0_7 = arith.constant 0 : index
    %c0_8 = arith.constant 0 : index
    %c0_9 = arith.constant 0 : index
    %18 = vector.load %arg5[%c0_7, %c0_8, %c0_9] : memref<1x8x256xf32, #tpu.memory_space<vmem>>, vector<1x8x256xf32>
    %19 = vector.shape_cast %18 : vector<1x8x256xf32> to vector<8x256xf32>
    %cst_10 = arith.constant dense<0.000000e+00> : vector<8x256xf32>
    %20 = tpu.matmul %17, %12, %cst_10 {dimension_numbers = #tpu.dot_dimension_numbers<[0], [0], [1], [1], [0, 1, 1, 1], [], []>} : vector<512x8xf32>, vector<512x256xf32>, vector<8x256xf32> -> vector<8x256xf32>
    %21 = arith.addf %19, %20 : vector<8x256xf32>
    %c0_11 = arith.constant 0 : index
    %c0_12 = arith.constant 0 : index
    %c0_13 = arith.constant 0 : index
    %22 = vector.load %arg5[%c0_11, %c0_12, %c0_13] : memref<1x8x256xf32, #tpu.memory_space<vmem>>, vector<1x8x256xf32>
    %23 = vector.shape_cast %22 : vector<1x8x256xf32> to vector<8x256xf32>
    %24 = vector.shape_cast %21 : vector<8x256xf32> to vector<1x8x256xf32>
    tpu.vector_store %arg5[%c0_11, %c0_12, %c0_13], %24 {strides = array<i32>} : memref<1x8x256xf32, #tpu.memory_space<vmem>>, vector<1x8x256xf32>,
    return
  }
  func.func @transform_0(%arg0: i32, %arg1: i32) -> (i32, i32) {
    %c1_i32 = arith.constant 1 : i32
    %0 = arith.muli %arg0, %c1_i32 : i32
    %1 = arith.addi %0, %arg1 : i32
    %c0_i32 = arith.constant 0 : i32
    %2 = arith.minsi %1, %c0_i32 : i32
    %c0_i32_0 = arith.constant 0 : i32
    %c0_i32_1 = arith.constant 0 : i32
    return %2, %c0_i32_0 : i32, i32
  }
  func.func @transform_1(%arg0: i32, %arg1: i32) -> (i32, i32) {
    %c0_i32 = arith.constant 0 : i32
    %c0_i32_0 = arith.constant 0 : i32
    %c0_i32_1 = arith.constant 0 : i32
    return %c0_i32, %c0_i32_0 : i32, i32
  }
  func.func @transform_2(%arg0: i32, %arg1: i32) -> (i32, i32) {
    %c0_i32 = arith.constant 0 : i32
    %c0_i32_0 = arith.constant 0 : i32
    %c0_i32_1 = arith.constant 0 : i32
    return %c0_i32, %c0_i32_0 : i32, i32
  }
  func.func @transform_3(%arg0: i32, %arg1: i32) -> (i32, i32, i32) {
    %c0_i32 = arith.constant 0 : i32
    %c0_i32_0 = arith.constant 0 : i32
    %c0_i32_1 = arith.constant 0 : i32
    return %arg0, %c0_i32, %c0_i32_0 : i32, i32, i32
  }
}

</mosaic_0001>

<bundles_post_ra>
// kernel: tpu_custom_call.1
= control target key start
LH: loop header
LB: loop body
LE: loop exit
PB: predicated region body
PF: predicated region fallthrough
CT: control target
= control target key end

     0   :  { %8 = vsyncpa [#allocation3], 0  ;;  %s2361_s0 = inlined_call_operand.hbm [shape: f32[500,256], index: 0, kind: input, shape index: {}]   ;;  %s2362_s1 = inlined_call_operand.vmem [shape: f32[256,8], index: 1, kind: input, shape index: {}]   ;;  %s2363_s2 = inlined_call_operand.vmem [shape: f32[1,8], index: 2, kind: input, shape index: {}]   ;;  %s2364_s3 = inlined_call_operand.hbm [shape: f32[1,8,256], index: 3, kind: output, shape index: {}]  }
   0x1   :  { %9 = vsyncpa [#allocation4], 0 }
   0x2   :  { %21 = vsyncadd [#allocation3], 256  ;;  %s1502_s12 = smov [#allocation2]   ;;  %s1454_s16 = scalar_lea.hbm %s2361_s0, 16128 }
   0x3   :  { %s27_s13 = sshll.u32 %s1502_s12, 4  ;;  %p1455_p0 = scmp.ne.s32.totalorder %s2361_s0, %s1454_s16  ;;  %s28_s13 = int_to_ptr.vmem [resolvable:$true] %s27_s13 }
   0x4   :  { %p1458_p1 = scmp.lt.u32.totalorder %s1454_s16, %s2361_s0 }
   0x6   :  { %p1460_p2 = pnand %p1458_p1, %p1455_p0 }
   0x8   :  { %1463 = shalt.err (!%p1460_p2)
}
   0x9   :  { %s1464_s21 = scalar_lea.vmem %s28_s13, 16128  ;;  %s1468_s22 = scalar_lea.vmem %s28_s13, 16384 }
   0xa   :  { %p1465_p3 = scmp.ne.s32.totalorder %s28_s13, %s1464_s21  ;;  %p1469_p4 = scmp.lt.s32.totalorder %s28_s13, %s28_s13 }
   0xb   :  { %p1470_p5 = scmp.lt.s32.totalorder %s1468_s22, %s1464_s21 }
   0xd   :  { %p1471_p6 = por %p1470_p5, %p1469_p4 }
   0xf   :  { %p1472_p7 = pnand %p1471_p6, %p1465_p3 }
  0x11   :  { %1475 = shalt.err (!%p1472_p7)
}
  0x12   :  { %s1503_s23 = smov 256   ;;  %s1504_s24 = smov 16  }
  0x13   :  { %33 = dma.hbm_to_vmem [thread:$0]  %s2361_s0, 16128, %s28_s13, [#allocation3], %s1503_s23, %s1503_s23, %s1504_s24  }
  0x14   :  { %1498 = dma.done.wait [#allocation3], 16384  }
  0x15   :  { %1499 = vsyncadd [#allocation3], 4294950912  ;;  %v1505_v0 = vmov 0.0|0.0   ;;  %v443_v1 = vld [vmem:[%s2362_s1] sm:$0xff]  ;;  %v444_v2 = vld [vmem:[%s2362_s1 + $0x8] sm:$0xff] }
  0x16   :  { %1165 = vmatprep.subr.bf16.mxu0 %v1505_v0  ;;  %1337 = vmatprep.subr.bf16.mxu1 %v1505_v0  ;;  %v445_v3 = vld [vmem:[%s2362_s1 + $0x10] sm:$0xff]  ;;  %v1166_v4 = vpack.c.bf16 %v444_v2, %v443_v1  ;;  %v446_v5 = vld [vmem:[%s2362_s1 + $0x18] sm:$0xff]  ;;  %v447_v7 = vld [vmem:[%s2362_s1 + $0x20] sm:$0xff] }
  0x17   :  { %v1169_v6 = vpack.c.bf16 %v446_v5, %v445_v3  ;;  %v448_v8 = vld [vmem:[%s2362_s1 + $0x28] sm:$0xff]  ;;  %v449_v10 = vld [vmem:[%s2362_s1 + $0x30] sm:$0xff]  ;;  %v450_v11 = vld [vmem:[%s2362_s1 + $0x38] sm:$0xff] }
  0x18   :  { %1167 = vmatpush1.bf16.msra.mxu0 %v1166_v4  ;;  %1353 = vmatpush1.bf16.msra.mxu1 %v1166_v4  ;;  %v1172_v9 = vpack.c.bf16 %v448_v8, %v447_v7  ;;  %v1570_v12 = vld [vmem:[#allocation2 + $0x8] sm:$0xff]  ;;  %v1175_v13 = vpack.c.bf16 %v450_v11, %v449_v10  ;;  %v451_v14 = vld [vmem:[%s2362_s1 + $0x40] sm:$0xff]  ;;  %v453_v17 = vld [vmem:[%s2362_s1 + $0x50] sm:$0xff] }
  0x19   :  { %1168 = vmatprep.subr.bf16.mxu0 %v1505_v0  ;;  %1338 = vmatprep.subr.bf16.mxu1 %v1505_v0  ;;  %v452_v15 = vld [vmem:[%s2362_s1 + $0x48] sm:$0xff]  ;;  %v454_v18 = vld [vmem:[%s2362_s1 + $0x58] sm:$0xff]  ;;  %v455_v21 = vld [vmem:[%s2362_s1 + $0x60] sm:$0xff] }
  0x1a   :  { %546 = vmatprep.mubr.f32.mxu0 %v1570_v12  ;;  %v1178_v16 = vpack.c.bf16 %v452_v15, %v451_v14  ;;  %v137_v19 = vld [vmem:[#allocation2 + $0x298] sm:$0xff]  ;;  %v1181_v20 = vpack.c.bf16 %v454_v18, %v453_v17  ;;  %v456_v22 = vld [vmem:[%s2362_s1 + $0x68] sm:$0xff]  ;;  %v1599_v24 = vld [vmem:[#allocation2 + $0x2a0] sm:$0xff] }
  0x1b   :  { %751 = vmatprep.mubr.f32.mxu1 %v137_v19  ;;  %v1595_v23 = vld [vmem:[#allocation2 + $0x2a8] sm:$0xff]  ;;  %2408 = vst [vmem:[#allocation9_spill] sm:$0xff] %v1599_v24  ;;  %v1601_v25 = vld [vmem:[#allocation2 + $0x2b8] sm:$0xff]  ;;  %v1603_v26 = vld [vmem:[#allocation2 + $0x2b0] sm:$0xff]  ;;  %v1184_v31 = vpack.c.bf16 %v456_v22, %v455_v21 }
  0x1c   :  { %1170 = vmatpush1.bf16.msra.mxu0 %v1169_v6  ;;  %1354 = vmatpush1.bf16.msra.mxu1 %v1169_v6  ;;  %2407 = vst [vmem:[#allocation8_spill] sm:$0xff] %v1595_v23  ;;  %2409 = vst [vmem:[#allocation10_spill] sm:$0xff] %v1603_v26  ;;  %v1609_v29 = vld [vmem:[#allocation2 + $0x2c8] sm:$0xff]  ;;  %v1611_v30 = vld [vmem:[#allocation2 + $0x2d8] sm:$0xff] }
  0x1d   :  { %1171 = vmatprep.subr.bf16.mxu0 %v1505_v0  ;;  %1339 = vmatprep.subr.bf16.mxu1 %v1505_v0  ;;  %2410 = vst [vmem:[#allocation11_spill] sm:$0xff] %v1609_v29  ;;  %2411 = vst [vmem:[#allocation12_spill] sm:$0xff] %v1611_v30  ;;  %v1613_v32 = vld [vmem:[#allocation2 + $0x2c0] sm:$0xff]  ;;  %v1617_v34 = vld [vmem:[#allocation2 + $0x2d0] sm:$0xff] }
  0x1e   :  { %2412 = vst [vmem:[#allocation13_spill] sm:$0xff] %v1613_v32  ;;  %2413 = vst [vmem:[#allocation14_spill] sm:$0xff] %v1617_v34  ;;  %v457_v35 = vld [vmem:[%s2362_s1 + $0x70] sm:$0xff]  ;;  %v458_v36 = vld [vmem:[%s2362_s1 + $0x78] sm:$0xff] }
  0x1f   :  { %v1629_v38 = vld [vmem:[#allocation2 + $0x2e8] sm:$0xff]  ;;  %v1631_v39 = vld [vmem:[#allocation2 + $0x2f8] sm:$0xff]  ;;  %v1633_v40 = vld [vmem:[#allocation2 + $0x2e0] sm:$0xff]  ;;  %v1187_v43 = vpack.c.bf16 %v458_v36, %v457_v35 }
  0x20   :  { %1173 = vmatpush1.bf16.msra.mxu0 %v1172_v9  ;;  %1355 = vmatpush1.bf16.msra.mxu1 %v1172_v9  ;;  %2414 = vst [vmem:[#allocation15_spill] sm:$0xff] %v1629_v38  ;;  %2415 = vst [vmem:[#allocation16_spill] sm:$0xff] %v1631_v39  ;;  %v1637_v42 = vld [vmem:[#allocation2 + $0x2f0] sm:$0xff]  ;;  %v459_v45 = vld [vmem:[%s2362_s1 + $0x80] sm:$0xff] }
  0x21   :  { %1174 = vmatprep.subr.bf16.mxu0 %v1505_v0  ;;  %1340 = vmatprep.subr.bf16.mxu1 %v1505_v0  ;;  %2416 = vst [vmem:[#allocation17_spill] sm:$0xff] %v1633_v40  ;;  %2417 = vst [vmem:[#allocation18_spill] sm:$0xff] %v1637_v42  ;;  %v460_v46 = vld [vmem:[%s2362_s1 + $0x88] sm:$0xff]  ;;  %v461_v48 = vld [vmem:[%s2362_s1 + $0x90] sm:$0xff] }
  0x22   :  { %v1190_v47 = vpack.c.bf16 %v460_v46, %v459_v45  ;;  %v462_v49 = vld [vmem:[%s2362_s1 + $0x98] sm:$0xff]  ;;  %v463_v51 = vld [vmem:[%s2362_s1 + $0xa0] sm:$0xff]  ;;  %v464_v52 = vld [vmem:[%s2362_s1 + $0xa8] sm:$0xff] }
  0x23   :  { %v1193_v50 = vpack.c.bf16 %v462_v49, %v461_v48  ;;  %v1196_v53 = vpack.c.bf16 %v464_v52, %v463_v51  ;;  %v465_v54 = vld [vmem:[%s2362_s1 + $0xb0] sm:$0xff]  ;;  %v466_v55 = vld [vmem:[%s2362_s1 + $0xb8] sm:$0xff]  ;;  %v467_v57 = vld [vmem:[%s2362_s1 + $0xc0] sm:$0xff] }
  0x24   :  { %1176 = vmatpush1.bf16.msra.mxu0 %v1175_v13  ;;  %1356 = vmatpush1.bf16.msra.mxu1 %v1175_v13  ;;  %v1199_v56 = vpack.c.bf16 %v466_v55, %v465_v54  ;;  %v468_v58 = vld [vmem:[%s2362_s1 + $0xc8] sm:$0xff]  ;;  %v469_v60 = vld [vmem:[%s2362_s1 + $0xd0] sm:$0xff]  ;;  %v470_v61 = vld [vmem:[%s2362_s1 + $0xd8] sm:$0xff] }
  0x25   :  { %1177 = vmatprep.subr.bf16.mxu0 %v1505_v0  ;;  %1341 = vmatprep.subr.bf16.mxu1 %v1505_v0  ;;  %v1202_v59 = vpack.c.bf16 %v468_v58, %v467_v57  ;;  %v1205_v62 = vpack.c.bf16 %v470_v61, %v469_v60  ;;  %v471_v63 = vld [vmem:[%s2362_s1 + $0xe0] sm:$0xff]  ;;  %v472_v1 = vld [vmem:[%s2362_s1 + $0xe8] sm:$0xff]  ;;  %v473_v3 = vld [vmem:[%s2362_s1 + $0xf0] sm:$0xff] }
  0x26   :  { %v1208_v2 = vpack.c.bf16 %v472_v1, %v471_v63  ;;  %v474_v4 = vld [vmem:[%s2362_s1 + $0xf8] sm:$0xff]  ;;  %v54_v8 = vld [vmem:[#allocation2] sm:$0xff]  ;;  %v56_v9 = vld [vmem:[#allocation2 + $0x10] sm:$0xff] }
  0x27   :  { %v1211_v5 = vpack.c.bf16 %v474_v4, %v473_v3  ;;  %v57_v6 = vld [vmem:[#allocation2 + $0x18] sm:$0xff]  ;;  %v136_v10 = vld [vmem:[#allocation2 + $0x290] sm:$0xff]  ;;  %v1215_v11 = vpack.c.bf16 %v56_v9, %v54_v8  ;;  %v59_v13 = vld [vmem:[#allocation2 + $0x28] sm:$0xff] }
  0x28   :  { %1179 = vmatpush1.bf16.msra.mxu0 %v1178_v16  ;;  %1357 = vmatpush1.bf16.msra.mxu1 %v1178_v16  ;;  %v1213_v7 = vpack.c.bf16 %v57_v6, %v1570_v12  ;;  %v61_v14 = vld [vmem:[#allocation2 + $0x38] sm:$0xff]  ;;  %v58_v16 = vld [vmem:[#allocation2 + $0x20] sm:$0xff]  ;;  %v60_v17 = vld [vmem:[#allocation2 + $0x30] sm:$0xff] }
  0x29   :  { %1180 = vmatprep.subr.bf16.mxu0 %v1505_v0  ;;  %1342 = vmatprep.subr.bf16.mxu1 %v1505_v0  ;;  %v1217_v15 = vpack.c.bf16 %v61_v14, %v59_v13  ;;  %v1219_v12 = vpack.c.bf16 %v60_v17, %v58_v16  ;;  %v63_v18 = vld [vmem:[#allocation2 + $0x48] sm:$0xff]  ;;  %v64_v21 = vld [vmem:[#allocation2 + $0x50] sm:$0xff]  ;;  %v69_v35 = vld [vmem:[#allocation2 + $0x78] sm:$0xff] }
  0x2a   :  { %v68_v45 = vld [vmem:[#allocation2 + $0x70] sm:$0xff]  ;;  %v1713_v48 = vld [vmem:[#allocation2 + $0x98] sm:$0xff]  ;;  %v151_v4 = vld [vmem:[#allocation2 + $0x308] sm:$0xff] }
  0x2b   :  { %v1717_v51 = vld [vmem:[#allocation2 + $0x90] sm:$0xff]  ;;  %v1723_v54 = vld [vmem:[#allocation2 + $0xb8] sm:$0xff]  ;;  %v1875_v44 = vld [vmem:[#allocation2 + $0x1a0] sm:$0xff] }
  0x2c   :  { %1182 = vmatpush1.bf16.msra.mxu0 %v1181_v20  ;;  %1358 = vmatpush1.bf16.msra.mxu1 %v1181_v20  ;;  %v62_v20 = vld [vmem:[#allocation2 + $0x40] sm:$0xff]  ;;  %v1730_v57 = vld [vmem:[#allocation2 + $0xb0] sm:$0xff]  ;;  %v1737_v60 = vld [vmem:[#allocation2 + $0xd8] sm:$0xff] }
  0x2d   :  { %1183 = vmatprep.subr.bf16.mxu0 %v1505_v0  ;;  %1343 = vmatprep.subr.bf16.mxu1 %v1505_v0  ;;  %v1223_v22 = vpack.c.bf16 %v64_v21, %v62_v20  ;;  %v1744_v63 = vld [vmem:[#allocation2 + $0xd0] sm:$0xff]  ;;  %v1751_v3 = vld [vmem:[#allocation2 + $0xf8] sm:$0xff]  ;;  %v1895_v28 = vld [vmem:[#allocation2 + $0x1c0] sm:$0xff] }
  0x2e   :  { %v1877_v41 = vld [vmem:[#allocation2 + $0x1b0] sm:$0xff]  ;;  %v1879_v37 = vld [vmem:[#allocation2 + $0x378] sm:$0xff] }
  0x2f   :  { %2431 = vst [vmem:[#allocation32_spill] sm:$0xff] %v1879_v37  ;;  %v1893_v33 = vld [vmem:[#allocation2 + $0x370] sm:$0xff] }
  0x30   :  { %1185 = vmatpush1.bf16.msra.mxu0 %v1184_v31  ;;  %1359 = vmatpush1.bf16.msra.mxu1 %v1184_v31  ;;  %v67_v31 = vld [vmem:[#allocation2 + $0x68] sm:$0xff]  ;;  %2432 = vst [vmem:[#allocation33_spill] sm:$0xff] %v1893_v33  ;;  %v1897_v27 = vld [vmem:[#allocation2 + $0x1d0] sm:$0xff] }
  0x31   :  { %1186 = vmatprep.subr.bf16.mxu0 %v1505_v0  ;;  %1344 = vmatprep.subr.bf16.mxu1 %v1505_v0  ;;  %v1225_v36 = vpack.c.bf16 %v69_v35, %v67_v31 }
  0x34   :  { %1188 = vmatpush1.bf16.msra.mxu0 %v1187_v43  ;;  %1360 = vmatpush1.bf16.msra.mxu1 %v1187_v43  ;;  %v66_v43 = vld [vmem:[#allocation2 + $0x60] sm:$0xff] }
  0x35   :  { %1189 = vmatprep.subr.bf16.mxu0 %v1505_v0  ;;  %1345 = vmatprep.subr.bf16.mxu1 %v1505_v0  ;;  %v1227_v46 = vpack.c.bf16 %v68_v45, %v66_v43 }
  0x38   :  { %1191 = vmatpush1.bf16.msra.mxu0 %v1190_v47  ;;  %1361 = vmatpush1.bf16.msra.mxu1 %v1190_v47  ;;  %v71_v47 = vld [vmem:[#allocation2 + $0x88] sm:$0xff] }
  0x39   :  { %1192 = vmatprep.subr.bf16.mxu0 %v1505_v0  ;;  %1346 = vmatprep.subr.bf16.mxu1 %v1505_v0  ;;  %v1229_v49 = vpack.c.bf16 %v1713_v48, %v71_v47 }
  0x3c   :  { %1194 = vmatpush1.bf16.msra.mxu0 %v1193_v50  ;;  %1362 = vmatpush1.bf16.msra.mxu1 %v1193_v50  ;;  %v70_v50 = vld [vmem:[#allocation2 + $0x80] sm:$0xff] }
  0x3d   :  { %1195 = vmatprep.subr.bf16.mxu0 %v1505_v0  ;;  %1347 = vmatprep.subr.bf16.mxu1 %v1505_v0  ;;  %v1231_v52 = vpack.c.bf16 %v1717_v51, %v70_v50 }
  0x40   :  { %1197 = vmatpush1.bf16.msra.mxu0 %v1196_v53  ;;  %1363 = vmatpush1.bf16.msra.mxu1 %v1196_v53  ;;  %v1721_v53 = vld [vmem:[#allocation2 + $0xa8] sm:$0xff] }
  0x41   :  { %1198 = vmatprep.subr.bf16.mxu0 %v1505_v0  ;;  %1348 = vmatprep.subr.bf16.mxu1 %v1505_v0  ;;  %v1233_v55 = vpack.c.bf16 %v1723_v54, %v1721_v53 }
  0x44   :  { %1200 = vmatpush1.bf16.msra.mxu0 %v1199_v56  ;;  %1364 = vmatpush1.bf16.msra.mxu1 %v1199_v56  ;;  %v1728_v56 = vld [vmem:[#allocation2 + $0xa0] sm:$0xff] }
  0x45   :  { %1201 = vmatprep.subr.bf16.mxu0 %v1505_v0  ;;  %1349 = vmatprep.subr.bf16.mxu1 %v1505_v0  ;;  %v1235_v58 = vpack.c.bf16 %v1730_v57, %v1728_v56 }
  0x48   :  { %1203 = vmatpush1.bf16.msra.mxu0 %v1202_v59  ;;  %1365 = vmatpush1.bf16.msra.mxu1 %v1202_v59  ;;  %v1735_v59 = vld [vmem:[#allocation2 + $0xc8] sm:$0xff] }
  0x49   :  { %1204 = vmatprep.subr.bf16.mxu0 %v1505_v0  ;;  %1350 = vmatprep.subr.bf16.mxu1 %v1505_v0  ;;  %v1237_v61 = vpack.c.bf16 %v1737_v60, %v1735_v59 }
  0x4c   :  { %1206 = vmatpush1.bf16.msra.mxu0 %v1205_v62  ;;  %1366 = vmatpush1.bf16.msra.mxu1 %v1205_v62  ;;  %v1742_v62 = vld [vmem:[#allocation2 + $0xc0] sm:$0xff] }
  0x4d   :  { %1207 = vmatprep.subr.bf16.mxu0 %v1505_v0  ;;  %1351 = vmatprep.subr.bf16.mxu1 %v1505_v0  ;;  %v1239_v1 = vpack.c.bf16 %v1744_v63, %v1742_v62 }
  0x50   :  { %1209 = vmatpush1.bf16.msra.mxu0 %v1208_v2  ;;  %1367 = vmatpush1.bf16.msra.mxu1 %v1208_v2  ;;  %v1749_v2 = vld [vmem:[#allocation2 + $0xe8] sm:$0xff] }
  0x51   :  { %1210 = vmatprep.subr.bf16.mxu0 %v1505_v0  ;;  %1352 = vmatprep.subr.bf16.mxu1 %v1505_v0  ;;  %v65_v0 = vld [vmem:[#allocation2 + $0x58] sm:$0xff] }
  0x52   :  { %v1221_v19 = vpack.c.bf16 %v65_v0, %v63_v18 }
  0x54   :  { %1212 = vmatpush1.bf16.msra.mxu0 %v1211_v5  ;;  %1368 = vmatpush1.bf16.msra.mxu1 %v1211_v5  ;;  %v1241_v5 = vpack.c.bf16 %v1751_v3, %v1749_v2 }
  0x55   :  { %1214 = vmatprep.subr.bf16.mxu1 %v1213_v7  ;;  %v1758_v7 = vld [vmem:[#allocation2 + $0xf0] sm:$0xff] }
  0x57   :  { %547 = vmatmul.mubr.f32.vlgmr.msra.gmra.mrb[0].mxu0 %v54_v8  ;;  %752 = vmatmul.mubr.f32.vlgmr.msra.gmra.mrb[0].mxu1 %v136_v10  ;;  %v1760_v8 = vld [vmem:[#allocation2 + $0x300] sm:$0xff]  ;;  %v1764_v10 = vld [vmem:[#allocation2 + $0x108] sm:$0xff] }
  0x58   :  { %551 = vmatprep.mubr.f32.mxu0 %v57_v6  ;;  %756 = vmatprep.mubr.f32.mxu1 %v1595_v23  ;;  %v1756_v6 = vld [vmem:[#allocation2 + $0xe0] sm:$0xff]  ;;  %2418 = vst [vmem:[#allocation19_spill] sm:$0xff] %v1760_v8 }
  0x59   :  { %1216 = vmatpush1.bf16.msra.mxu1 %v1215_v11  ;;  %v1766_v11 = vld [vmem:[#allocation2 + $0x118] sm:$0xff] }
  0x5a   :  { %1218 = vmatprep.subr.bf16.mxu1 %v1217_v15  ;;  %v1773_v15 = vld [vmem:[#allocation2 + $0x100] sm:$0xff] }
  0x5b   :  { %552 = vmatmul.mubr.f32.gmra.mrb[2].mxu0 %v56_v9  ;;  %757 = vmatmul.mubr.f32.gmra.mrb[2].mxu1 %v1599_v24  ;;  %v1243_v9 = vpack.c.bf16 %v1758_v7, %v1756_v6 }
  0x5c   :  { %556 = vmatprep.mubr.f32.mxu0 %v59_v13  ;;  %761 = vmatprep.mubr.f32.mxu1 %v1601_v25  ;;  %v1768_v13 = vld [vmem:[#allocation2 + $0x318] sm:$0xff] }
  0x5d   :  { %1220 = vmatpush1.bf16.msra.mxu1 %v1219_v12  ;;  %2419 = vst [vmem:[#allocation20_spill] sm:$0xff] %v1768_v13 }
  0x5e   :  { %1222 = vmatprep.subr.bf16.mxu1 %v1221_v19  ;;  %v1786_v19 = vld [vmem:[#allocation2 + $0x138] sm:$0xff] }
  0x5f   :  { %557 = vmatmul.mubr.f32.gmra.mrb[4].mxu0 %v58_v16  ;;  %762 = vmatmul.mubr.f32.gmra.mrb[4].mxu1 %v1603_v26  ;;  %v1776_v16 = vld [vmem:[#allocation2 + $0x110] sm:$0xff] }
  0x60   :  { %561 = vmatprep.mubr.f32.mxu0 %v61_v14  ;;  %766 = vmatprep.mubr.f32.mxu1 %v1609_v29  ;;  %v1245_v14 = vpack.c.bf16 %v1766_v11, %v1764_v10  ;;  %v1247_v12 = vpack.c.bf16 %v1776_v16, %v1773_v15 }
  0x61   :  { %1224 = vmatpush1.bf16.msra.mxu1 %v1223_v22  ;;  %v1795_v22 = vld [vmem:[#allocation2 + $0x320] sm:$0xff] }
  0x62   :  { %1226 = vmatprep.subr.bf16.mxu1 %v1225_v36  ;;  %2422 = vst [vmem:[#allocation23_spill] sm:$0xff] %v1795_v22 }
  0x63   :  { %562 = vmatmul.mubr.f32.gmra.mrb[6].mxu0 %v60_v17  ;;  %767 = vmatmul.mubr.f32.gmra.mrb[6].mxu1 %v1613_v32  ;;  %v1778_v17 = vld [vmem:[#allocation2 + $0x310] sm:$0xff] }
  0x64   :  { %566 = vmatprep.mubr.f32.mxu0 %v63_v18  ;;  %771 = vmatprep.mubr.f32.mxu1 %v1611_v30  ;;  %2420 = vst [vmem:[#allocation21_spill] sm:$0xff] %v1778_v17  ;;  %v1782_v18 = vld [vmem:[#allocation2 + $0x128] sm:$0xff] }
  0x65   :  { %1228 = vmatpush1.bf16.msra.mxu1 %v1227_v46 }
  0x66   :  { %1230 = vmatprep.subr.bf16.mxu1 %v1229_v49  ;;  %v1817_v49 = vld [vmem:[#allocation2 + $0x150] sm:$0xff] }
  0x67   :  { %567 = vmatmul.mubr.f32.gmra.mrb[8].mxu0 %v62_v20  ;;  %772 = vmatmul.mubr.f32.gmra.mrb[8].mxu1 %v1617_v34  ;;  %v1249_v20 = vpack.c.bf16 %v1786_v19, %v1782_v18 }
  0x68   :  { %571 = vmatprep.mubr.f32.mxu0 %v65_v0  ;;  %776 = vmatprep.mubr.f32.mxu1 %v1629_v38  ;;  %v1784_v0 = vld [vmem:[#allocation2 + $0x328] sm:$0xff] }
  0x69   :  { %1232 = vmatpush1.bf16.msra.mxu1 %v1231_v52  ;;  %2421 = vst [vmem:[#allocation22_spill] sm:$0xff] %v1784_v0 }
  0x6a   :  { %1234 = vmatprep.subr.bf16.mxu1 %v1233_v55  ;;  %v1823_v55 = vld [vmem:[#allocation2 + $0x168] sm:$0xff] }
  0x6b   :  { %572 = vmatmul.mubr.f32.gmra.mrb[10].mxu0 %v64_v21  ;;  %777 = vmatmul.mubr.f32.gmra.mrb[10].mxu1 %v1633_v40  ;;  %v1793_v21 = vld [vmem:[#allocation2 + $0x120] sm:$0xff] }
  0x6c   :  { %576 = vmatprep.mubr.f32.mxu0 %v67_v31  ;;  %781 = vmatprep.mubr.f32.mxu1 %v1631_v39  ;;  %v1797_v31 = vld [vmem:[#allocation2 + $0x130] sm:$0xff] }
  0x6d   :  { %1236 = vmatpush1.bf16.msra.mxu1 %v1235_v58  ;;  %v1251_v36 = vpack.c.bf16 %v1797_v31, %v1793_v21  ;;  %v1833_v58 = vld [vmem:[#allocation2 + $0x340] sm:$0xff] }
  0x6e   :  { %1238 = vmatprep.subr.bf16.mxu1 %v1237_v61  ;;  %2426 = vst [vmem:[#allocation27_spill] sm:$0xff] %v1833_v58  ;;  %v1835_v61 = vld [vmem:[#allocation2 + $0x160] sm:$0xff] }
  0x6f   :  { %577 = vmatmul.mubr.f32.gmra.mrb[12].mxu0 %v66_v43  ;;  %782 = vmatmul.mubr.f32.gmra.mrb[12].mxu1 %v1637_v42  ;;  %v1803_v43 = vld [vmem:[#allocation2 + $0x148] sm:$0xff] }
  0x70   :  { %581 = vmatprep.mubr.f32.mxu0 %v69_v35  ;;  %786 = vmatprep.mubr.f32.mxu1 %v151_v4  ;;  %v1799_v35 = vld [vmem:[#allocation2 + $0x338] sm:$0xff] }
  0x71   :  { %1240 = vmatpush1.bf16.msra.mxu1 %v1239_v1  ;;  %2423 = vst [vmem:[#allocation24_spill] sm:$0xff] %v1799_v35  ;;  %v1837_v1 = vld [vmem:[#allocation2 + $0x170] sm:$0xff]  ;;  %v1839_v4 = vld [vmem:[#allocation2 + $0x358] sm:$0xff] }
  0x72   :  { %1242 = vmatprep.subr.bf16.mxu1 %v1241_v5  ;;  %2427 = vst [vmem:[#allocation28_spill] sm:$0xff] %v1839_v4  ;;  %v1259_v5 = vpack.c.bf16 %v1837_v1, %v1835_v61 }
  0x73   :  { %582 = vmatmul.mubr.f32.gmra.mrb[14].mxu0 %v68_v45  ;;  %787 = vmatmul.mubr.f32.gmra.mrb[14].mxu1 %v1760_v8  ;;  %v1805_v45 = vld [vmem:[#allocation2 + $0x158] sm:$0xff] }
  0x74   :  { %586 = vmatprep.mubr.f32.mxu0 %v71_v47  ;;  %791 = vmatprep.mubr.f32.mxu1 %v1768_v13  ;;  %v1253_v46 = vpack.c.bf16 %v1805_v45, %v1803_v43  ;;  %v1813_v47 = vld [vmem:[#allocation2 + $0x330] sm:$0xff] }
  0x75   :  { %1244 = vmatpush1.bf16.msra.mxu1 %v1243_v9  ;;  %2424 = vst [vmem:[#allocation25_spill] sm:$0xff] %v1813_v47  ;;  %v1843_v9 = vld [vmem:[#allocation2 + $0x188] sm:$0xff] }
  0x76   :  { %1246 = vmatprep.subr.bf16.mxu1 %v1245_v14  ;;  %v1853_v14 = vld [vmem:[#allocation2 + $0x350] sm:$0xff] }
  0x77   :  { %587 = vmatmul.mubr.f32.gmra.mrb[16].mxu0 %v70_v50  ;;  %792 = vmatmul.mubr.f32.gmra.mrb[16].mxu1 %v1778_v17  ;;  %v1819_v50 = vld [vmem:[#allocation2 + $0x348] sm:$0xff]  ;;  %2428 = vst [vmem:[#allocation29_spill] sm:$0xff] %v1853_v14 }
  0x78   :  { %591 = vmatprep.mubr.f32.mxu0 %v1713_v48  ;;  %796 = vmatprep.mubr.f32.mxu1 %v1784_v0  ;;  %v1815_v48 = vld [vmem:[#allocation2 + $0x140] sm:$0xff]  ;;  %2425 = vst [vmem:[#allocation26_spill] sm:$0xff] %v1819_v50 }
  0x79   :  { %1248 = vmatpush1.bf16.msra.mxu1 %v1247_v12  ;;  %v1255_v52 = vpack.c.bf16 %v1817_v49, %v1815_v48  ;;  %v1855_v12 = vld [vmem:[#allocation2 + $0x180] sm:$0xff] }
  0x7a   :  { %1250 = vmatprep.subr.bf16.mxu1 %v1249_v20  ;;  %v1857_v20 = vld [vmem:[#allocation2 + $0x190] sm:$0xff] }
  0x7b   :  { %592 = vmatmul.mubr.f32.gmra.mrb[18].mxu0 %v1717_v51  ;;  %797 = vmatmul.mubr.f32.gmra.mrb[18].mxu1 %v1795_v22  ;;  %v1825_v51 = vld [vmem:[#allocation2 + $0x178] sm:$0xff] }
  0x7c   :  { %596 = vmatprep.mubr.f32.mxu0 %v1721_v53  ;;  %801 = vmatprep.mubr.f32.mxu1 %v1799_v35  ;;  %v1257_v53 = vpack.c.bf16 %v1825_v51, %v1823_v55 }
  0x7d   :  { %1252 = vmatpush1.bf16.msra.mxu1 %v1251_v36  ;;  %v1859_v36 = vld [vmem:[#allocation2 + $0x368] sm:$0xff] }
  0x7e   :  { %1254 = vmatprep.subr.bf16.mxu1 %v1253_v46  ;;  %2429 = vst [vmem:[#allocation30_spill] sm:$0xff] %v1859_v36  ;;  %v1263_v46 = vpack.c.bf16 %v1857_v20, %v1855_v12 }
  0x7f   :  { %597 = vmatmul.mubr.f32.gmra.mrb[20].mxu0 %v1728_v56  ;;  %802 = vmatmul.mubr.f32.gmra.mrb[20].mxu1 %v1813_v47  ;;  %v1845_v56 = vld [vmem:[#allocation2 + $0x198] sm:$0xff] }
  0x80   :  { %601 = vmatprep.mubr.f32.mxu0 %v1723_v54  ;;  %806 = vmatprep.mubr.f32.mxu1 %v1819_v50  ;;  %v1261_v54 = vpack.c.bf16 %v1845_v56, %v1843_v9 }
  0x81   :  { %1256 = vmatpush1.bf16.msra.mxu1 %v1255_v52  ;;  %v1863_v52 = vld [vmem:[#allocation2 + $0x1a8] sm:$0xff] }
  0x82   :  { %1258 = vmatprep.subr.bf16.mxu1 %v1257_v53  ;;  %v1873_v53 = vld [vmem:[#allocation2 + $0x360] sm:$0xff] }
  0x83   :  { %602 = vmatmul.mubr.f32.gmra.mrb[22].mxu0 %v1730_v57  ;;  %807 = vmatmul.mubr.f32.gmra.mrb[22].mxu1 %v1833_v58  ;;  %v1865_v57 = vld [vmem:[#allocation2 + $0x1b8] sm:$0xff]  ;;  %2430 = vst [vmem:[#allocation31_spill] sm:$0xff] %v1873_v53 }
  0x84   :  { %606 = vmatprep.mubr.f32.mxu0 %v1735_v59  ;;  %811 = vmatprep.mubr.f32.mxu1 %v1839_v4  ;;  %v1265_v59 = vpack.c.bf16 %v1865_v57, %v1863_v52  ;;  %v1919_v58 = vld [vmem:[#allocation2 + $0x398] sm:$0xff] }
  0x85   :  { %1260 = vmatpush1.bf16.msra.mxu1 %v1259_v5  ;;  %v1267_v5 = vpack.c.bf16 %v1877_v41, %v1875_v44  ;;  %2435 = vst [vmem:[#allocation36_spill] sm:$0xff] %v1919_v58 }
  0x86   :  { %1262 = vmatprep.subr.bf16.mxu1 %v1261_v54  ;;  %v1883_v54 = vld [vmem:[#allocation2 + $0x1c8] sm:$0xff] }
  0x87   :  { %607 = vmatmul.mubr.f32.gmra.mrb[24].mxu0 %v1742_v62  ;;  %812 = vmatmul.mubr.f32.gmra.mrb[24].mxu1 %v1853_v14  ;;  %v1885_v62 = vld [vmem:[#allocation2 + $0x1d8] sm:$0xff]  ;;  %v1917_v14 = vld [vmem:[#allocation2 + $0x1f0] sm:$0xff] }
  0x88   :  { %611 = vmatprep.mubr.f32.mxu0 %v1737_v60  ;;  %816 = vmatprep.mubr.f32.mxu1 %v1859_v36  ;;  %v1269_v60 = vpack.c.bf16 %v1885_v62, %v1883_v54  ;;  %v1899_v36 = vld [vmem:[#allocation2 + $0x388] sm:$0xff] }
  0x89   :  { %1264 = vmatpush1.bf16.msra.mxu1 %v1263_v46  ;;  %2433 = vst [vmem:[#allocation34_spill] sm:$0xff] %v1899_v36  ;;  %v1271_v46 = vpack.c.bf16 %v1897_v27, %v1895_v28 }
  0x8a   :  { %1266 = vmatprep.subr.bf16.mxu1 %v1265_v59  ;;  %v1903_v59 = vld [vmem:[#allocation2 + $0x1e8] sm:$0xff] }
  0x8b   :  { %612 = vmatmul.mubr.f32.gmra.mrb[26].mxu0 %v1744_v63  ;;  %817 = vmatmul.mubr.f32.gmra.mrb[26].mxu1 %v1873_v53  ;;  %v1905_v63 = vld [vmem:[#allocation2 + $0x1f8] sm:$0xff]  ;;  %v1913_v53 = vld [vmem:[#allocation2 + $0x380] sm:$0xff] }
  0x8c   :  { %616 = vmatprep.mubr.f32.mxu0 %v1749_v2  ;;  %821 = vmatprep.mubr.f32.mxu1 %v1879_v37  ;;  %v1273_v2 = vpack.c.bf16 %v1905_v63, %v1903_v59  ;;  %2434 = vst [vmem:[#allocation35_spill] sm:$0xff] %v1913_v53  ;;  %v1915_v37 = vld [vmem:[#allocation2 + $0x1e0] sm:$0xff] }
  0x8d   :  { %1268 = vmatpush1.bf16.msra.mxu1 %v1267_v5  ;;  %v1275_v5 = vpack.c.bf16 %v1917_v14, %v1915_v37 }
  0x8e   :  { %1270 = vmatprep.subr.bf16.mxu1 %v1269_v60  ;;  %v1923_v60 = vld [vmem:[#allocation2 + $0x208] sm:$0xff] }
  0x8f   :  { %617 = vmatmul.mubr.f32.gmra.mrb[28].mxu0 %v1756_v6  ;;  %822 = vmatmul.mubr.f32.gmra.mrb[28].mxu1 %v1893_v33  ;;  %v1925_v6 = vld [vmem:[#allocation2 + $0x218] sm:$0xff]  ;;  %v1935_v33 = vld [vmem:[#allocation2 + $0x3a8] sm:$0xff] }
  0x90   :  { %621 = vmatprep.mubr.f32.mxu0 %v1751_v3  ;;  %826 = vmatprep.mubr.f32.mxu1 %v1899_v36  ;;  %v1277_v3 = vpack.c.bf16 %v1925_v6, %v1923_v60  ;;  %v1933_v36 = vld [vmem:[#allocation2 + $0x390] sm:$0xff]  ;;  %2437 = vst [vmem:[#allocation38_spill] sm:$0xff] %v1935_v33 }
  0x91   :  { %1272 = vmatpush1.bf16.msra.mxu1 %v1271_v46  ;;  %2436 = vst [vmem:[#allocation37_spill] sm:$0xff] %v1933_v36  ;;  %v1943_v46 = vld [vmem:[#allocation2 + $0x3b8] sm:$0xff] }
  0x92   :  { %1274 = vmatprep.subr.bf16.mxu1 %v1273_v2  ;;  %2439 = vst [vmem:[#allocation40_spill] sm:$0xff] %v1943_v46  ;;  %v1951_v2 = vld [vmem:[#allocation2 + $0x3c8] sm:$0xff] }
  0x93   :  { %622 = vmatmul.mubr.f32.gmra.mrb[30].mxu0 %v1758_v7  ;;  %827 = vmatmul.mubr.f32.gmra.mrb[30].mxu1 %v1913_v53  ;;  %v1941_v7 = vld [vmem:[#allocation2 + $0x3a0] sm:$0xff]  ;;  %2441 = vst [vmem:[#allocation42_spill] sm:$0xff] %v1951_v2 }
  0x94   :  { %626 = vmatprep.mubr.f32.mxu0 %v1764_v10  ;;  %831 = vmatprep.mubr.f32.mxu1 %v1919_v58  ;;  %2438 = vst [vmem:[#allocation39_spill] sm:$0xff] %v1941_v7  ;;  %v185_v10 = vlaneseq }
  0x95   :  { %1276 = vmatpush1.bf16.msra.mxu1 %v1275_v5  ;;  %v1959_v5 = vld [vmem:[#allocation2 + $0x3d8] sm:$0xff] }
  0x96   :  { %1278 = vmatprep.subr.bf16.mxu1 %v1277_v3  ;;  %2443 = vst [vmem:[#allocation44_spill] sm:$0xff] %v1959_v5  ;;  %v1969_v3 = vld [vmem:[#allocation2 + $0x3e8] sm:$0xff] }
  0x97   :  { %627 = vmatmul.mubr.f32.gmra.mrb[32].mxu0 %v1773_v15  ;;  %832 = vmatmul.mubr.f32.gmra.mrb[32].mxu1 %v1933_v36  ;;  %v1949_v15 = vld [vmem:[#allocation2 + $0x3b0] sm:$0xff]  ;;  %2446 = vst [vmem:[#allocation47_spill] sm:$0xff] %v1969_v3 }
  0x98   :  { %631 = vmatprep.mubr.f32.mxu0 %v1766_v11  ;;  %836 = vmatprep.mubr.f32.mxu1 %v1935_v33  ;;  %2440 = vst [vmem:[#allocation41_spill] sm:$0xff] %v1949_v15  ;;  %v186_v11 = vshrl.u32 %v185_v10, 7 }
  0x9b   :  { %632 = vmatmul.mubr.f32.gmra.mrb[34].mxu0 %v1776_v16  ;;  %837 = vmatmul.mubr.f32.gmra.mrb[34].mxu1 %v1941_v7  ;;  %v1957_v16 = vld [vmem:[#allocation2 + $0x3c0] sm:$0xff] }
  0x9c   :  { %636 = vmatprep.mubr.f32.mxu0 %v1782_v18  ;;  %841 = vmatprep.mubr.f32.mxu1 %v1943_v46  ;;  %2442 = vst [vmem:[#allocation43_spill] sm:$0xff] %v1957_v16  ;;  %v1961_v18 = vadd.s32 496, %v186_v11 }
  0x9e   :  { %2444 = vst [vmem:[#allocation45_spill] sm:$0xff] %v1961_v18  ;;  %vm313_vm0 = vcmp.lt.s32.totalorder %v1961_v18, 500 }
  0x9f   :  { %637 = vmatmul.mubr.f32.gmra.mrb[36].mxu0 %v1793_v21  ;;  %842 = vmatmul.mubr.f32.gmra.mrb[36].mxu1 %v1949_v15  ;;  %v1967_v21 = vld [vmem:[#allocation2 + $0x3d0] sm:$0xff] }
  0xa0   :  { %641 = vmatprep.mubr.f32.mxu0 %v1786_v19  ;;  %846 = vmatprep.mubr.f32.mxu1 %v1951_v2  ;;  %2445 = vst [vmem:[#allocation46_spill] sm:$0xff] %v1967_v21  ;;  %v1978_v19 = vld [vmem:[#allocation2 + $0x3e0] sm:$0xff] }
  0xa1   :  { %2447 = vst [vmem:[#allocation48_spill] sm:$0xff] %v1978_v19 }
  0xa3   :  { %642 = vmatmul.mubr.f32.gmra.mrb[38].mxu0 %v1797_v31  ;;  %847 = vmatmul.mubr.f32.gmra.mrb[38].mxu1 %v1957_v16  ;;  %v1506_v31 = vmov 0.0  }
  0xa4   :  { %646 = vmatprep.mubr.f32.mxu0 %v1803_v43  ;;  %851 = vmatprep.mubr.f32.mxu1 %v1959_v5  ;;  %v2021_v43 = vld [vmem:[#allocation2 + $0x230] sm:$0xff] }
  0xa7   :  { %647 = vmatmul.mubr.f32.gmra.mrb[40].mxu0 %v1815_v48  ;;  %852 = vmatmul.mubr.f32.gmra.mrb[40].mxu1 %v1967_v21  ;;  %v2027_v48 = vld [vmem:[#allocation2 + $0x240] sm:$0xff] }
  0xa8   :  { %651 = vmatprep.mubr.f32.mxu0 %v1805_v45  ;;  %1161 = vmatprep.mubr.msk.f32.mxu1 %vm313_vm0, %v1969_v3  ;;  %v2023_v45 = vld [vmem:[#allocation2 + $0x248] sm:$0xff] }
  0xab   :  { %652 = vmatmul.mubr.f32.gmra.mrb[42].mxu0 %v1817_v49  ;;  %1162 = vmatmul.mubr.msk.f32.gmra.mrb[42].mxu1 %vm313_vm0, %v1978_v19  ;;  %v2029_v49 = vld [vmem:[#allocation2 + $0x258] sm:$0xff] }
  0xac   :  { %656 = vmatprep.mubr.f32.mxu0 %v1823_v55  ;;  %861 = vmatprep.mubr.f32.mxu1 %v1506_v31  ;;  %v2033_v55 = vld [vmem:[#allocation2 + $0x250] sm:$0xff] }
  0xaf   :  { %657 = vmatmul.mubr.f32.gmra.mrb[44].mxu0 %v1835_v61  ;;  %862 = vmatmul.mubr.f32.gmra.mrb[44].mxu1 %v1506_v31  ;;  %v2039_v61 = vld [vmem:[#allocation2 + $0x260] sm:$0xff] }
  0xb0   :  { %661 = vmatprep.mubr.f32.mxu0 %v1825_v51  ;;  %v2035_v51 = vld [vmem:[#allocation2 + $0x268] sm:$0xff] }
  0xb3   :  { %662 = vmatmul.mubr.f32.gmra.mrb[46].mxu0 %v1837_v1  ;;  %v2041_v1 = vld [vmem:[#allocation2 + $0x278] sm:$0xff] }
  0xb4   :  { %666 = vmatprep.mubr.f32.mxu0 %v1843_v9  ;;  %v2045_v9 = vld [vmem:[#allocation2 + $0x270] sm:$0xff] }
  0xb7   :  { %667 = vmatmul.mubr.f32.gmra.mrb[48].mxu0 %v1855_v12 }
  0xb8   :  { %671 = vmatprep.mubr.f32.mxu0 %v1845_v56  ;;  %v2047_v56 = vld [vmem:[#allocation2 + $0x288] sm:$0xff] }
  0xbb   :  { %672 = vmatmul.mubr.f32.gmra.mrb[50].mxu0 %v1857_v20 }
  0xbc   :  { %676 = vmatprep.mubr.f32.mxu0 %v1863_v52 }
  0xbf   :  { %677 = vmatmul.mubr.f32.gmra.mrb[52].mxu0 %v1875_v44  ;;  %v2005_v44 = vld [vmem:[#allocation2 + $0x200] sm:$0xff] }
  0xc0   :  { %681 = vmatprep.mubr.f32.mxu0 %v1865_v57 }
  0xc3   :  { %682 = vmatmul.mubr.f32.gmra.mrb[54].mxu0 %v1877_v41  ;;  %v2011_v41 = vld [vmem:[#allocation2 + $0x228] sm:$0xff] }
  0xc4   :  { %686 = vmatprep.mubr.f32.mxu0 %v1883_v54 }
  0xc7   :  { %687 = vmatmul.mubr.f32.gmra.mrb[56].mxu0 %v1895_v28  ;;  %v2009_v28 = vld [vmem:[#allocation2 + $0x210] sm:$0xff] }
  0xc8   :  { %691 = vmatprep.mubr.f32.mxu0 %v1885_v62 }
  0xcb   :  { %692 = vmatmul.mubr.f32.gmra.mrb[58].mxu0 %v1897_v27  ;;  %v2015_v27 = vld [vmem:[#allocation2 + $0x220] sm:$0xff] }
  0xcc   :  { %696 = vmatprep.mubr.f32.mxu0 %v1903_v59 }
  0xcf   :  { %697 = vmatmul.mubr.f32.gmra.mrb[60].mxu0 %v1915_v37  ;;  %v2017_v37 = vld [vmem:[#allocation2 + $0x238] sm:$0xff] }
  0xd0   :  { %701 = vmatprep.mubr.f32.mxu0 %v1905_v63 }
  0xd3   :  { %702 = vmatmul.mubr.f32.gmra.mrb[62].mxu0 %v1917_v14  ;;  %v2051_v14 = vld [vmem:[#allocation2 + $0x280] sm:$0xff] }
  0xd4   :  { %706 = vmatprep.mubr.f32.mxu0 %v1923_v60 }
  0xd7   :  { %707 = vmatmul.mubr.f32.gmra.mrb[64].mxu0 %v2005_v44 }
  0xd8   :  { %711 = vmatprep.mubr.f32.mxu0 %v1925_v6 }
  0xdb   :  { %712 = vmatmul.mubr.f32.gmra.mrb[66].mxu0 %v2009_v28 }
  0xdc   :  { %716 = vmatprep.mubr.f32.mxu0 %v2011_v41 }
  0xdf   :  { %717 = vmatmul.mubr.f32.gmra.mrb[68].mxu0 %v2015_v27 }
  0xe0   :  { %721 = vmatprep.mubr.f32.mxu0 %v2017_v37 }
  0xe3   :  { %722 = vmatmul.mubr.f32.gmra.mrb[70].mxu0 %v2021_v43 }
  0xe4   :  { %726 = vmatprep.mubr.f32.mxu0 %v2023_v45 }
  0xe7   :  { %727 = vmatmul.mubr.f32.gmra.mrb[72].mxu0 %v2027_v48 }
  0xe8   :  { %731 = vmatprep.mubr.f32.mxu0 %v2029_v49 }
  0xeb   :  { %732 = vmatmul.mubr.f32.gmra.mrb[74].mxu0 %v2033_v55 }
  0xec   :  { %736 = vmatprep.mubr.f32.mxu0 %v2035_v51 }
  0xef   :  { %737 = vmatmul.mubr.f32.gmra.mrb[76].mxu0 %v2039_v61 }
  0xf0   :  { %741 = vmatprep.mubr.f32.mxu0 %v2041_v1 }
  0xf3   :  { %742 = vmatmul.mubr.f32.gmra.mrb[78].mxu0 %v2045_v9 }
  0xf4   :  { %746 = vmatprep.mubr.f32.mxu0 %v2047_v56 }
  0xf7   :  { %747 = vmatmul.mubr.f32.gmra.mrb[80].mxu0 %v2051_v14 }
 0x12a   :  { %v2054_v12 = vpop.f32.mrb[0].mxu0  ;;  %v2056_v20 = vpop.f32.mrb[0].mxu1 }
 0x12b   :  { %v550_v52 = vpop.f32.mrb[1].mxu0  ;;  %v755_v57 = vpop.f32.mrb[1].mxu1 }
 0x12e   :  { %v2058_v54 = vpop.f32.mrb[2].mxu0  ;;  %v2060_v62 = vpop.f32.mrb[2].mxu1 }
 0x12f   :  { %v555_v59 = vpop.f32.mrb[3].mxu0  ;;  %v760_v63 = vpop.f32.mrb[3].mxu1 }
 0x132   :  { %v2062_v60 = vpop.f32.mrb[4].mxu0  ;;  %v2064_v6 = vpop.f32.mrb[4].mxu1 }
 0x133   :  { %v560_v10 = vpop.f32.mrb[5].mxu0  ;;  %v765_v11 = vpop.f32.mrb[5].mxu1 }
 0x136   :  { %v2066_v31 = vpop.f32.mrb[6].mxu0  ;;  %v2068_v19 = vpop.f32.mrb[6].mxu1 }
 0x137   :  { %v565_v18 = vpop.f32.mrb[7].mxu0  ;;  %v770_v3 = vpop.f32.mrb[7].mxu1 }
 0x13a   :  { %v2070_v52 = vpop.f32.mrb[8].mxu0  ;;  %v2072_v57 = vpop.f32.mrb[8].mxu1 }
 0x13b   :  { %v570_v21 = vpop.f32.mrb[9].mxu0  ;;  %v775_v16 = vpop.f32.mrb[9].mxu1 }
 0x13e   :  { %v2074_v59 = vpop.f32.mrb[10].mxu0  ;;  %v2076_v63 = vpop.f32.mrb[10].mxu1 }
 0x13f   :  { %v575_v5 = vpop.f32.mrb[11].mxu0  ;;  %v780_v2 = vpop.f32.mrb[11].mxu1 }
 0x142   :  { %v2078_v10 = vpop.f32.mrb[12].mxu0  ;;  %v2080_v11 = vpop.f32.mrb[12].mxu1 }
 0x143   :  { %v580_v15 = vpop.f32.mrb[13].mxu0  ;;  %v785_v7 = vpop.f32.mrb[13].mxu1 }
 0x146   :  { %v2082_v18 = vpop.f32.mrb[14].mxu0  ;;  %v2084_v3 = vpop.f32.mrb[14].mxu1 }
 0x147   :  { %v585_v46 = vpop.f32.mrb[15].mxu0  ;;  %v790_v33 = vpop.f32.mrb[15].mxu1 }
 0x14a   :  { %v2086_v21 = vpop.f32.mrb[16].mxu0  ;;  %v2088_v16 = vpop.f32.mrb[16].mxu1 }
 0x14b   :  { %v590_v36 = vpop.f32.mrb[17].mxu0  ;;  %v795_v53 = vpop.f32.mrb[17].mxu1 }
 0x14e   :  { %v2090_v5 = vpop.f32.mrb[18].mxu0  ;;  %v2092_v2 = vpop.f32.mrb[18].mxu1 }
 0x14f   :  { %v595_v58 = vpop.f32.mrb[19].mxu0  ;;  %v800_v4 = vpop.f32.mrb[19].mxu1 }
 0x152   :  { %v2094_v15 = vpop.f32.mrb[20].mxu0  ;;  %v2096_v7 = vpop.f32.mrb[20].mxu1 }
 0x153   :  { %v600_v50 = vpop.f32.mrb[21].mxu0  ;;  %v805_v47 = vpop.f32.mrb[21].mxu1 }
 0x156   :  { %v2098_v46 = vpop.f32.mrb[22].mxu0  ;;  %v2100_v33 = vpop.f32.mrb[22].mxu1 }
 0x157   :  { %v605_v22 = vpop.f32.mrb[23].mxu0  ;;  %v810_v35 = vpop.f32.mrb[23].mxu1 }
 0x15a   :  { %v2102_v36 = vpop.f32.mrb[24].mxu0  ;;  %v2104_v53 = vpop.f32.mrb[24].mxu1 }
 0x15b   :  { %v610_v0 = vpop.f32.mrb[25].mxu0  ;;  %v815_v40 = vpop.f32.mrb[25].mxu1 }
 0x15c   :  { %v2121_v40 = vld [vmem:[%s2363_s2] ss:$0 sm:$0xff]  ;;  %s1507_s2 = smov [#allocation5]  }
 0x15d   :  { %v2135_v29 = vadd.f32 %v2121_v40, %v2060_v62  ;;  %v2147_v62 = vadd.f32 %v2121_v40, %v2064_v6  ;;  %v2159_v6 = vadd.f32 %v2121_v40, %v2068_v19  ;;  %v2171_v19 = vadd.f32 %v2121_v40, %v2072_v57  ;;  %s1149_s8 = sshll.u32 %s1507_s2, 4  ;;  %s1150_s8 = int_to_ptr.vmem [resolvable:$true] %s1149_s8 }
 0x15e   :  { %v2106_v58 = vpop.f32.mrb[26].mxu0  ;;  %v2108_v4 = vpop.f32.mrb[26].mxu1  ;;  %v2183_v57 = vadd.f32 %v2121_v40, %v2076_v63  ;;  %v2195_v63 = vadd.f32 %v2121_v40, %v2080_v11  ;;  %s1476_s9 = scalar_lea.vmem %s1150_s8, 256  ;;  %p1481_p9 = scmp.lt.s32.totalorder %s1150_s8, %s1150_s8 }
 0x15f   :  { %v615_v42 = vpop.f32.mrb[27].mxu0  ;;  %v820_v17 = vpop.f32.mrb[27].mxu1  ;;  %p1477_p8 = scmp.ne.s32.totalorder %s1150_s8, %s1476_s9  ;;  %p1482_p10 = scmp.lt.s32.totalorder %s1476_s9, %s1476_s9 }
 0x160   :  { %v2125_v42 = vadd.f32 %v2121_v40, %v2056_v20 }
 0x161   :  { %p1483_p11 = por %p1482_p10, %p1481_p9 }
 0x162   :  { %v2110_v50 = vpop.f32.mrb[28].mxu0  ;;  %v2112_v47 = vpop.f32.mrb[28].mxu1 }
 0x163   :  { %v620_v8 = vpop.f32.mrb[29].mxu0  ;;  %v825_v38 = vpop.f32.mrb[29].mxu1  ;;  %p1484_p12 = pnand %p1483_p11, %p1477_p8 }
 0x164   :  { %v549_v38 = vadd.f32 %v2121_v40, %v2054_v12  ;;  %v554_v12 = vadd.f32 %v2121_v40, %v2058_v54  ;;  %v559_v54 = vadd.f32 %v2121_v40, %v2062_v60  ;;  %v564_v60 = vadd.f32 %v2121_v40, %v2066_v31 }
 0x165   :  { %v569_v31 = vadd.f32 %v2121_v40, %v2070_v52  ;;  %v574_v52 = vadd.f32 %v2121_v40, %v2074_v59  ;;  %v579_v59 = vadd.f32 %v2121_v40, %v2078_v10 }
 0x166   :  { %v2114_v22 = vpop.f32.mrb[30].mxu0  ;;  %v2116_v35 = vpop.f32.mrb[30].mxu1 }
 0x167   :  { %v625_v39 = vpop.f32.mrb[31].mxu0  ;;  %v830_v13 = vpop.f32.mrb[31].mxu1 }
 0x16a   :  { %v628_v17 = vpop.f32.mrb[32].mxu0  ;;  %v833_v0 = vpop.f32.mrb[32].mxu1 }
 0x16b   :  { %v629_v8 = vadd.f32 %v2121_v40, %v628_v17  ;;  %v630_v32 = vpop.f32.mrb[33].mxu0  ;;  %v2131_v39 = vadd.f32 %v2121_v40, %v833_v0  ;;  %v835_v13 = vpop.f32.mrb[33].mxu1 }
 0x16d   :  { %v1377_v34 = vpack.i.bf16 %v549_v38, %v629_v8 }
 0x16e   :  { %v633_v30 = vpop.f32.mrb[34].mxu0  ;;  %v838_v24 = vpop.f32.mrb[34].mxu1 }
 0x16f   :  { %v634_v17 = vadd.f32 %v2121_v40, %v633_v30  ;;  %v635_v32 = vpop.f32.mrb[35].mxu0  ;;  %1378 = vxpose.xlu0.b32.start [1/16] (narrow) %v1377_v34, 8  ;;  %v2143_v0 = vadd.f32 %v2121_v40, %v838_v24  ;;  %v840_v38 = vpop.f32.mrb[35].mxu1 }
 0x171   :  { %v1379_v8 = vpack.i.bf16 %v554_v12, %v634_v17 }
 0x172   :  { %v638_v20 = vpop.f32.mrb[36].mxu0  ;;  %v843_v26 = vpop.f32.mrb[36].mxu1 }
 0x173   :  { %v639_v30 = vadd.f32 %v2121_v40, %v638_v20  ;;  %v640_v34 = vpop.f32.mrb[37].mxu0  ;;  %1380 = vxpose.xlu0.b32.cont [2/16] (narrow) %v1379_v8, 8  ;;  %v2155_v24 = vadd.f32 %v2121_v40, %v843_v26  ;;  %v845_v32 = vpop.f32.mrb[37].mxu1 }
 0x175   :  { %v1381_v12 = vpack.i.bf16 %v559_v54, %v639_v30 }
 0x176   :  { %v643_v38 = vpop.f32.mrb[38].mxu0  ;;  %v848_v13 = vpop.f32.mrb[38].mxu1 }
 0x177   :  { %v644_v20 = vadd.f32 %v2121_v40, %v643_v38  ;;  %v645_v8 = vpop.f32.mrb[39].mxu0  ;;  %1382 = vxpose.xlu0.b32.cont [3/16] (narrow) %v1381_v12, 8  ;;  %v2167_v26 = vadd.f32 %v2121_v40, %v848_v13  ;;  %v850_v34 = vpop.f32.mrb[39].mxu1 }
 0x179   :  { %v1383_v54 = vpack.i.bf16 %v564_v60, %v644_v20 }
 0x17a   :  { %v648_v32 = vpop.f32.mrb[40].mxu0  ;;  %v853_v17 = vpop.f32.mrb[40].mxu1 }
 0x17b   :  { %v649_v38 = vadd.f32 %v2121_v40, %v648_v32  ;;  %v650_v12 = vpop.f32.mrb[41].mxu0  ;;  %1384 = vxpose.xlu0.b32.cont [4/16] (narrow) %v1383_v54, 8  ;;  %v2179_v13 = vadd.f32 %v2121_v40, %v853_v17  ;;  %v855_v8 = vpop.f32.mrb[41].mxu1 }
 0x17d   :  { %v1385_v60 = vpack.i.bf16 %v569_v31, %v649_v38 }
 0x17e   :  { %v653_v34 = vpop.f32.mrb[42].mxu0  ;;  %v858_v30 = vpop.f32.mrb[42].mxu1 }
 0x17f   :  { %v654_v32 = vadd.f32 %v2121_v40, %v653_v34  ;;  %v655_v54 = vpop.f32.mrb[43].mxu0  ;;  %1386 = vxpose.xlu0.b32.cont [5/16] (narrow) %v1385_v60, 8  ;;  %v2191_v17 = vadd.f32 %v2121_v40, %v858_v30  ;;  %v860_v12 = vpop.f32.mrb[43].mxu1 }
 0x181   :  { %v1387_v31 = vpack.i.bf16 %v574_v52, %v654_v32  ;;  %v584_v32 = vadd.f32 %v2121_v40, %v2082_v18 }
 0x182   :  { %v658_v8 = vpop.f32.mrb[44].mxu0  ;;  %v863_v20 = vpop.f32.mrb[44].mxu1 }
 0x183   :  { %v659_v34 = vadd.f32 %v2121_v40, %v658_v8  ;;  %v660_v60 = vpop.f32.mrb[45].mxu0  ;;  %1388 = vxpose.xlu0.b32.cont [6/16] (narrow) %v1387_v31, 8  ;;  %v2203_v30 = vadd.f32 %v2121_v40, %v863_v20  ;;  %v865_v54 = vpop.f32.mrb[45].mxu1  ;;  %v589_v31 = vadd.f32 %v2121_v40, %v2086_v21 }
 0x184   :  { %v594_v54 = vadd.f32 %v2121_v40, %v2090_v5 }
 0x185   :  { %v1389_v12 = vpack.i.bf16 %v579_v59, %v659_v34 }
 0x186   :  { %v663_v52 = vpop.f32.mrb[46].mxu0 }
 0x187   :  { %v664_v38 = vadd.f32 %v2121_v40, %v663_v52  ;;  %v665_v23 = vpop.f32.mrb[47].mxu0  ;;  %1390 = vxpose.xlu0.b32.cont [7/16] (narrow) %v1389_v12, 8 }
 0x189   :  { %v1391_v10 = vpack.i.bf16 %v584_v32, %v664_v38  ;;  %v599_v38 = vadd.f32 %v2121_v40, %v2094_v15 }
 0x18a   :  { %v668_v8 = vpop.f32.mrb[48].mxu0 }
 0x18b   :  { %v669_v20 = vadd.f32 %v2121_v40, %v668_v8  ;;  %v670_v60 = vpop.f32.mrb[49].mxu0  ;;  %1392 = vxpose.xlu0.b32.cont [8/16] (narrow) %v1391_v10, 8  ;;  %v604_v8 = vadd.f32 %v2121_v40, %v2098_v46 }
 0x18c   :  { %v609_v60 = vadd.f32 %v2121_v40, %v2102_v36 }
 0x18d   :  { %v1393_v59 = vpack.i.bf16 %v589_v31, %v669_v20 }
 0x18e   :  { %v673_v34 = vpop.f32.mrb[50].mxu0 }
 0x18f   :  { %v674_v18 = vadd.f32 %v2121_v40, %v673_v34  ;;  %v675_v11 = vpop.f32.mrb[51].mxu0  ;;  %1394 = vxpose.xlu0.b32.cont [9/16] (narrow) %v1393_v59, 8 }
 0x191   :  { %v1395_v23 = vpack.i.bf16 %v594_v54, %v674_v18  ;;  %v614_v18 = vadd.f32 %v2121_v40, %v2106_v58 }
 0x192   :  { %v678_v12 = vpop.f32.mrb[52].mxu0 }
 0x193   :  { %v679_v21 = vadd.f32 %v2121_v40, %v678_v12  ;;  %v680_v52 = vpop.f32.mrb[53].mxu0  ;;  %1396 = vxpose.xlu0.b32.cont [10/16] (narrow) %v1395_v23, 8 }
 0x195   :  { %v1397_v32 = vpack.i.bf16 %v599_v38, %v679_v21  ;;  %v619_v21 = vadd.f32 %v2121_v40, %v2110_v50 }
 0x196   :  { %v683_v10 = vpop.f32.mrb[54].mxu0 }
 0x197   :  { %v684_v5 = vadd.f32 %v2121_v40, %v683_v10  ;;  %v685_v31 = vpop.f32.mrb[55].mxu0  ;;  %1398 = vxpose.xlu0.b32.cont [11/16] (narrow) %v1397_v32, 8 }
 0x198   :  { %v789_v31 = vadd.f32 %v2121_v40, %v2084_v3 }
 0x199   :  { %v1399_v11 = vpack.i.bf16 %v604_v8, %v684_v5  ;;  %v624_v8 = vadd.f32 %v2121_v40, %v2114_v22 }
 0x19a   :  { %v688_v20 = vpop.f32.mrb[56].mxu0 }
 0x19b   :  { %v689_v15 = vadd.f32 %v2121_v40, %v688_v20  ;;  %v690_v59 = vpop.f32.mrb[57].mxu0  ;;  %1400 = vxpose.xlu0.b32.cont [12/16] (narrow) %v1399_v11, 8 }
 0x19d   :  { %v1401_v34 = vpack.i.bf16 %v609_v60, %v689_v15  ;;  %v794_v15 = vadd.f32 %v2121_v40, %v2088_v16 }
 0x19e   :  { %v693_v54 = vpop.f32.mrb[58].mxu0 }
 0x19f   :  { %v694_v46 = vadd.f32 %v2121_v40, %v693_v54  ;;  %v695_v23 = vpop.f32.mrb[59].mxu0  ;;  %1402 = vxpose.xlu0.b32.cont [13/16] (narrow) %v1401_v34, 8 }
 0x1a1   :  { %v1403_v12 = vpack.i.bf16 %v614_v18, %v694_v46  ;;  %v799_v18 = vadd.f32 %v2121_v40, %v2092_v2 }
 0x1a2   :  { %v698_v38 = vpop.f32.mrb[60].mxu0 }
 0x1a3   :  { %v699_v36 = vadd.f32 %v2121_v40, %v698_v38  ;;  %v700_v52 = vpop.f32.mrb[61].mxu0  ;;  %1404 = vxpose.xlu0.b32.cont [14/16] (narrow) %v1403_v12, 8  ;;  %v804_v38 = vadd.f32 %v2121_v40, %v2096_v7 }
 0x1a5   :  { %v1405_v32 = vpack.i.bf16 %v619_v21, %v699_v36 }
 0x1a6   :  { %v703_v10 = vpop.f32.mrb[62].mxu0 }
 0x1a7   :  { %v704_v58 = vadd.f32 %v2121_v40, %v703_v10  ;;  %v705_v5 = vpop.f32.mrb[63].mxu0  ;;  %1406 = vxpose.xlu0.b32.cont [15/16] (narrow) %v1405_v32, 8  ;;  %v809_v32 = vadd.f32 %v2121_v40, %v2100_v33 }
 0x1a8   :  { %v814_v5 = vadd.f32 %v2121_v40, %v2104_v53 }
 0x1a9   :  { %v1407_v11 = vpack.i.bf16 %v624_v8, %v704_v58 }
 0x1aa   :  { %v708_v20 = vpop.f32.mrb[64].mxu0 }
 0x1ab   :  { %v709_v50 = vadd.f32 %v2121_v40, %v708_v20  ;;  %v710_v60 = vpop.f32.mrb[65].mxu0  ;;  %1408 = vxpose.xlu0.b32.end [16/16] (narrow) %v1407_v11, 8 }
 0x1ad   :  { %v1414_v59 = vpack.i.bf16 %v709_v50, %v789_v31  ;;  %v819_v50 = vadd.f32 %v2121_v40, %v2108_v4 }
 0x1ae   :  { %v713_v34 = vpop.f32.mrb[66].mxu0 }
 0x1af   :  { %v714_v22 = vadd.f32 %v2121_v40, %v713_v34  ;;  %v715_v54 = vpop.f32.mrb[67].mxu0  ;;  %1415 = vxpose.xlu1.b32.start [1/16] (narrow) %v1414_v59, 8  ;;  %v824_v34 = vadd.f32 %v2121_v40, %v2112_v47  ;;  %v2448_v47 = vpack.i.bf16 %v2125_v42, %v2131_v39  ;;  %v2453_v42 = vpack.i.bf16 %v2183_v57, %v2191_v17  ;;  %v2464_v57 = vld [vmem:[#allocation13_spill] sm:$0xff] }
 0x1b0   :  { %v1279_v39 = vpack.c.bf16 %v2009_v28, %v2005_v44  ;;  %v1289_v44 = vpack.c.bf16 %v2041_v1, %v2035_v51  ;;  %v1291_v28 = vpack.c.bf16 %v2045_v9, %v2039_v61  ;;  %v2460_v61 = vld [vmem:[#allocation12_spill] sm:$0xff]  ;;  %v2461_v1 = vld [vmem:[#allocation11_spill] sm:$0xff] }
 0x1b1   :  { %v1416_v46 = vpack.i.bf16 %v714_v22, %v794_v15  ;;  %v2462_v9 = vpack.c.bf16 %v2460_v61, %v2461_v1 }
 0x1b2   :  { %v718_v3 = vpop.f32.mrb[68].mxu0 }
 0x1b3   :  { %v719_v23 = vadd.f32 %v2121_v40, %v718_v3  ;;  %v720_v12 = vpop.f32.mrb[69].mxu0  ;;  %1417 = vxpose.xlu1.b32.cont [2/16] (narrow) %v1416_v46, 8  ;;  %v829_v46 = vadd.f32 %v2121_v40, %v2116_v35  ;;  %v2451_v35 = vpack.i.bf16 %v2159_v6, %v2167_v26  ;;  %v1281_v6 = vpack.c.bf16 %v2017_v37, %v2011_v41  ;;  %v1451_v41 = vld [vmem:[#allocation2 + $0x298] sm:$0xff]  ;;  %v1452_v37 = vld [vmem:[#allocation2 + $0x290] sm:$0xff] }
 0x1b4   :  { %v1283_v26 = vpack.c.bf16 %v2021_v43, %v2015_v27  ;;  %v1293_v27 = vpack.c.bf16 %v1451_v41, %v2047_v56  ;;  %v1295_v43 = vpack.c.bf16 %v1452_v37, %v2051_v14  ;;  %v2463_v56 = vld [vmem:[#allocation14_spill] sm:$0xff]  ;;  %v1453_v14 = vld [vmem:[#allocation2 + $0x308] sm:$0xff] }
 0x1b5   :  { %v1418_v21 = vpack.i.bf16 %v719_v23, %v799_v18  ;;  %v2465_v17 = vpack.c.bf16 %v2463_v56, %v2464_v57 }
 0x1b6   :  { %v723_v16 = vpop.f32.mrb[70].mxu0 }
 0x1b7   :  { %v724_v36 = vadd.f32 %v2121_v40, %v723_v16  ;;  %v725_v52 = vpop.f32.mrb[71].mxu0  ;;  %1419 = vxpose.xlu1.b32.cont [3/16] (narrow) %v1418_v21, 8  ;;  %v2449_v21 = vpack.i.bf16 %v2135_v29, %v2143_v0  ;;  %v2450_v16 = vpack.i.bf16 %v2147_v62, %v2155_v24  ;;  %v2454_v29 = vpack.i.bf16 %v2195_v63, %v2203_v30  ;;  %v2466_v63 = vld [vmem:[#allocation20_spill] sm:$0xff] }
 0x1b8   :  { %v1309_v30 = vpack.c.bf16 %v2466_v63, %v1453_v14  ;;  %v2468_v52 = vld [vmem:[#allocation15_spill] sm:$0xff] }
 0x1b9   :  { %v1420_v10 = vpack.i.bf16 %v724_v36, %v804_v38  ;;  %v2467_v36 = vld [vmem:[#allocation16_spill] sm:$0xff] }
 0x1ba   :  { %v728_v2 = vpop.f32.mrb[72].mxu0 }
 0x1bb   :  { %v729_v8 = vadd.f32 %v2121_v40, %v728_v2  ;;  %v730_v58 = vpop.f32.mrb[73].mxu0  ;;  %1421 = vxpose.xlu1.b32.cont [4/16] (narrow) %v1420_v10, 8  ;;  %v2471_v10 = vld [vmem:[#allocation21_spill] sm:$0xff] }
 0x1bc   :  { %v2473_v58 = vld [vmem:[#allocation17_spill] sm:$0xff] }
 0x1bd   :  { %v1422_v31 = vpack.i.bf16 %v729_v8, %v809_v32  ;;  %v2469_v32 = vpack.c.bf16 %v2467_v36, %v2468_v52  ;;  %v2472_v8 = vld [vmem:[#allocation18_spill] sm:$0xff] }
 0x1be   :  { %v733_v7 = vpop.f32.mrb[74].mxu0 }
 0x1bf   :  { %v734_v11 = vadd.f32 %v2121_v40, %v733_v7  ;;  %v735_v20 = vpop.f32.mrb[75].mxu0  ;;  %1423 = vxpose.xlu1.b32.cont [5/16] (narrow) %v1422_v31, 8  ;;  %v2475_v31 = vld [vmem:[#allocation22_spill] sm:$0xff]  ;;  %v2476_v7 = vld [vmem:[#allocation24_spill] sm:$0xff] }
 0x1c0   :  { %v2477_v20 = vld [vmem:[#allocation23_spill] sm:$0xff] }
 0x1c1   :  { %v1424_v60 = vpack.i.bf16 %v734_v11, %v814_v5  ;;  %v2474_v5 = vpack.c.bf16 %v2472_v8, %v2473_v58  ;;  %v1313_v11 = vpack.c.bf16 %v2476_v7, %v2475_v31 }
 0x1c2   :  { %v738_v33 = vpop.f32.mrb[76].mxu0 }
 0x1c3   :  { %v739_v15 = vadd.f32 %v2121_v40, %v738_v33  ;;  %v740_v59 = vpop.f32.mrb[77].mxu0  ;;  %1425 = vxpose.xlu1.b32.cont [6/16] (narrow) %v1424_v60, 8  ;;  %v2479_v33 = vld [vmem:[#allocation26_spill] sm:$0xff] }
 0x1c5   :  { %v1426_v22 = vpack.i.bf16 %v739_v15, %v819_v50  ;;  %v2478_v50 = vld [vmem:[#allocation25_spill] sm:$0xff]  ;;  %v2480_v15 = vld [vmem:[#allocation28_spill] sm:$0xff] }
 0x1c6   :  { %v743_v53 = vpop.f32.mrb[78].mxu0  ;;  %v1315_v60 = vpack.c.bf16 %v2478_v50, %v2477_v20  ;;  %v1317_v59 = vpack.c.bf16 %v2480_v15, %v2479_v33 }
 0x1c7   :  { %v744_v54 = vadd.f32 %v2121_v40, %v743_v53  ;;  %v745_v18 = vpop.f32.mrb[79].mxu0  ;;  %1427 = vxpose.xlu1.b32.cont [7/16] (narrow) %v1426_v22, 8  ;;  %v2482_v22 = vld [vmem:[#allocation29_spill] sm:$0xff] }
 0x1c8   :  { %v2484_v18 = vld [vmem:[#allocation32_spill] sm:$0xff] }
 0x1c9   :  { %v1428_v3 = vpack.i.bf16 %v744_v54, %v824_v34  ;;  %v2481_v34 = vld [vmem:[#allocation27_spill] sm:$0xff]  ;;  %v2483_v54 = vld [vmem:[#allocation30_spill] sm:$0xff] }
 0x1ca   :  { %v748_v4 = vpop.f32.mrb[80].mxu0  ;;  %v1319_v53 = vpack.c.bf16 %v2482_v22, %v2481_v34 }
 0x1cb   :  { %v749_v23 = vadd.f32 %v2121_v40, %v748_v4  ;;  %v750_v12 = vpop.f32.mrb[81].mxu0  ;;  %1429 = vxpose.xlu1.b32.cont [8/16] (narrow) %v1428_v3, 8  ;;  %v2452_v40 = vpack.i.bf16 %v2171_v19, %v2179_v13  ;;  %v1285_v19 = vpack.c.bf16 %v2029_v49, %v2023_v45  ;;  %v1287_v13 = vpack.c.bf16 %v2033_v55, %v2027_v48  ;;  %v2455_v45 = vld [vmem:[#allocation8_spill] sm:$0xff]  ;;  %v2457_v49 = vld [vmem:[#allocation10_spill] sm:$0xff]  ;;  %v2458_v55 = vld [vmem:[#allocation9_spill] sm:$0xff] }
 0x1cc   :  { %v2456_v48 = vpack.c.bf16 %v1601_v25, %v2455_v45  ;;  %v2459_v51 = vpack.c.bf16 %v2457_v49, %v2458_v55  ;;  %v2470_v25 = vld [vmem:[#allocation19_spill] sm:$0xff]  ;;  %v2486_v4 = vld [vmem:[#allocation33_spill] sm:$0xff]  ;;  %v2487_v12 = vld [vmem:[#allocation34_spill] sm:$0xff] }
 0x1cd   :  { %v1430_v38 = vpack.i.bf16 %v749_v23, %v829_v46  ;;  %v1311_v2 = vpack.c.bf16 %v2471_v10, %v2470_v25  ;;  %v1321_v46 = vpack.c.bf16 %v2484_v18, %v2483_v54  ;;  %v2485_v3 = vld [vmem:[#allocation31_spill] sm:$0xff]  ;;  %v2501_v45 = vld [vmem:[#allocation48_spill] sm:$0xff] }
 0x1ce   :  { %v1323_v23 = vpack.c.bf16 %v2486_v4, %v2485_v3 }
 0x1cf   :  { %1431 = vxpose.xlu1.b32.cont [9/16] (narrow) %v1430_v38, 8  ;;  %v2488_v38 = vld [vmem:[#allocation36_spill] sm:$0xff] }
 0x1d3   :  { %1433 = vxpose.xlu1.b32.cont [10/16] (narrow) %v2448_v47, 8  ;;  %v1325_v47 = vpack.c.bf16 %v2488_v38, %v2487_v12 }
 0x1d7   :  { %1435 = vxpose.xlu1.b32.cont [11/16] (narrow) %v2449_v21, 8  ;;  %v2489_v21 = vld [vmem:[#allocation35_spill] sm:$0xff] }
 0x1db   :  { %1437 = vxpose.xlu1.b32.cont [12/16] (narrow) %v2450_v16, 8  ;;  %v2490_v16 = vld [vmem:[#allocation37_spill] sm:$0xff] }
 0x1df   :  { %1439 = vxpose.xlu1.b32.cont [13/16] (narrow) %v2451_v35, 8  ;;  %v1327_v35 = vpack.c.bf16 %v2490_v16, %v2489_v21 }
 0x1e3   :  { %1441 = vxpose.xlu1.b32.cont [14/16] (narrow) %v2452_v40, 8  ;;  %v2491_v40 = vld [vmem:[#allocation38_spill] sm:$0xff] }
 0x1e7   :  { %1443 = vxpose.xlu1.b32.cont [15/16] (narrow) %v2453_v42, 8  ;;  %v2492_v42 = vld [vmem:[#allocation40_spill] sm:$0xff] }
 0x1eb   :  { %1445 = vxpose.xlu1.b32.end [16/16] (narrow) %v2454_v29, 8  ;;  %v1329_v29 = vpack.c.bf16 %v2492_v42, %v2491_v40 }
 0x1ef   :  { %v1409_v0 = vpop.trf.xlu0 }
 0x1f0   :  { %v1413_v62 = vunpack.i.h.bf16 %v1409_v0  ;;  %v1410_v24 = vunpack.i.l.bf16 %v1409_v0  ;;  %v2494_v0 = vld [vmem:[#allocation41_spill] sm:$0xff] }
 0x1f2   :  { %1061 = vmatprep.mubr.f32.mxu1 %v1410_v24  ;;  %v2495_v24 = vld [vmem:[#allocation42_spill] sm:$0xff] }
 0x1f3   :  { %1062 = vmatmul.mubr.f32.vlgmr.msra.gmra.mrb[46].mxu1 %v1413_v62 }
 0x1f4   :  { %1280 = vmatpush1.bf16.msra.mxu1 %v1279_v39  ;;  %v2493_v39 = vld [vmem:[#allocation39_spill] sm:$0xff] }
 0x1f5   :  { %1282 = vmatprep.subr.bf16.mxu1 %v1281_v6  ;;  %v1331_v62 = vpack.c.bf16 %v2494_v0, %v2493_v39  ;;  %v2496_v6 = vld [vmem:[#allocation44_spill] sm:$0xff] }
 0x1f8   :  { %1284 = vmatpush1.bf16.msra.mxu1 %v1283_v26  ;;  %v1333_v26 = vpack.c.bf16 %v2496_v6, %v2495_v24 }
 0x1f9   :  { %1286 = vmatprep.subr.bf16.mxu1 %v1285_v19  ;;  %v2497_v19 = vld [vmem:[#allocation43_spill] sm:$0xff] }
 0x1fc   :  { %1288 = vmatpush1.bf16.msra.mxu1 %v1287_v13  ;;  %v2498_v13 = vld [vmem:[#allocation46_spill] sm:$0xff] }
 0x1fd   :  { %1290 = vmatprep.subr.bf16.mxu1 %v1289_v44  ;;  %v1335_v44 = vpack.c.bf16 %v2498_v13, %v2497_v19 }
 0x200   :  { %1292 = vmatpush1.bf16.msra.mxu1 %v1291_v28  ;;  %v2499_v28 = vld [vmem:[#allocation47_spill] sm:$0xff] }
 0x201   :  { %1294 = vmatprep.subr.bf16.mxu1 %v1293_v27 }
 0x204   :  { %1296 = vmatpush1.bf16.msra.mxu1 %v1295_v43 }
 0x205   :  { %1298 = vmatprep.subr.bf16.mxu1 %v2456_v48 }
 0x208   :  { %1300 = vmatpush1.bf16.msra.mxu1 %v2459_v51 }
 0x209   :  { %1302 = vmatprep.subr.bf16.mxu1 %v2462_v9 }
 0x20c   :  { %1304 = vmatpush1.bf16.msra.mxu1 %v2465_v17 }
 0x20d   :  { %1306 = vmatprep.subr.bf16.mxu1 %v2469_v32 }
 0x210   :  { %1308 = vmatpush1.bf16.msra.mxu1 %v2474_v5 }
 0x211   :  { %1310 = vmatprep.subr.bf16.mxu1 %v1309_v30 }
 0x214   :  { %1312 = vmatpush1.bf16.msra.mxu1 %v1311_v2 }
 0x215   :  { %1314 = vmatprep.subr.bf16.mxu1 %v1313_v11 }
 0x218   :  { %1316 = vmatpush1.bf16.msra.mxu1 %v1315_v60 }
 0x219   :  { %1318 = vmatprep.subr.bf16.mxu1 %v1317_v59 }
 0x21c   :  { %1320 = vmatpush1.bf16.msra.mxu1 %v1319_v53 }
 0x21d   :  { %1322 = vmatprep.subr.bf16.mxu1 %v1321_v46 }
 0x220   :  { %1324 = vmatpush1.bf16.msra.mxu1 %v1323_v23 }
 0x221   :  { %1326 = vmatprep.subr.bf16.mxu1 %v1325_v47 }
 0x224   :  { %1328 = vmatpush1.bf16.msra.mxu1 %v1327_v35 }
 0x225   :  { %1330 = vmatprep.subr.bf16.mxu1 %v1329_v29 }
 0x228   :  { %1332 = vmatpush1.bf16.msra.mxu1 %v1331_v62 }
 0x229   :  { %1334 = vmatprep.subr.bf16.mxu1 %v1333_v26 }
 0x22c   :  { %1336 = vmatpush1.bf16.msra.mxu1 %v1335_v44 }
 0x22d   :  { %1163 = vmatprep.subr.msk.mxu1 %vm313_vm0, %v2499_v28 }
 0x22f   :  { %v1446_v27 = vpop.trf.xlu1 }
 0x230   :  { %v1450_v37 = vunpack.i.h.bf16 %v1446_v27  ;;  %v1447_v43 = vunpack.i.l.bf16 %v1446_v27  ;;  %1164 = vmatpush1.msk.msra.mxu1 %vm313_vm0, %v2501_v45 }
 0x232   :  { %1132 = vmatprep.mubr.f32.mxu1 %v1447_v43 }
 0x233   :  { %1133 = vmatmul.mubr.f32.vlgmr.msra.gmra.mrb[46].mxu1 %v1450_v37 }
 0x306   :  { %v1134_v48 = vpop.f32.mrb[46].mxu1 }
 0x307   :  { %v1136_v49 = vpop.f32.mrb[47].mxu1  ;;  %1141 = vst [vmem:[#allocation5] sm:$0xff] %v1134_v48 }
 0x308   :  { %1142 = vst [vmem:[#allocation5 + $0x8] sm:$0xff] %v1136_v49 }
 0x309   :  { %1487 = shalt.err (!%p1484_p12)
}
 0x30a   :  { %s1488_s12 = scalar_lea.hbm %s2364_s3, 256 }
 0x30b   :  { %p1489_p13 = scmp.ne.s32.totalorder %s2364_s3, %s1488_s12  ;;  %p1492_p0 = scmp.lt.u32.totalorder %s1488_s12, %s2364_s3 }
 0x30d   :  { %p1494_p1 = pnand %p1492_p0, %p1489_p13 }
 0x30f   :  { %1497 = shalt.err (!%p1494_p1)
}
 0x310   :  { %1152 = dma.vmem_to_hbm [thread:$0]  %s1150_s8, 256, %s2364_s3, [#allocation4]  }
 0x311   :  { %1500 = dma.done.wait [#allocation4], 256  }
 0x312   :  { %1501 = vsyncadd [#allocation4], 4294967040 }
 0x313   :  { %1156 = vsyncpa [#allocation3], 1 }
 0x314   :  { %1157 = vsyncpa [#allocation4], 1 }

</bundles_post_ra>
